<compile_context>
chip_gen: v5e
topology: v5e:2x2
jax: 0.10.0
libtpu: 0.0.40
codegen_flags: <defaults>
</compile_context>

<pallas_src>
import jax
import jax.numpy as jnp
from jax.experimental import pallas as pl
from jax.experimental.pallas import tpu as pltpu


# ----------------------------------------------------------------------------
# Kernels
# ----------------------------------------------------------------------------
def _upconv_kernel(x_ref, w9_ref, sup_ref, o_ref, stats_ref, p_ref):
    """Fused nearest-2x upsample + 3x3 conv (pad=1) + per-block BN statistics.

    x_ref    : (1, (H+2)*Cin, W)  bf16  pre-padded input, rows grouped (h, ci)
    w9_ref   : (Cout, 9*Cin)      bf16  conv weights, tap-major packing
    sup_ref  : (W, W2+2)          bf16  0/1 width-upsample + zero-pad matrix
    o_ref    : (1, Cout, TH*W2)   bf16  lane-dense flattened output row tile
    stats_ref: (1, 1, Cout, 2)    f32   per-block (sum, centered M2) per channel
    p_ref    : (9*Cin, TH*W2)     bf16  scratch: packed im2col patch matrix
    """
    W, WP = sup_ref.shape
    cout, nine_cin = w9_ref.shape
    cin = nine_cin // 9
    W2 = 2 * W
    lw = o_ref.shape[2]            # TH * W2 (flattened, lane-dense)
    TH = lw // W2                  # output rows per tile (even)
    HT2 = TH // 2                  # original-resolution rows per tile
    cdtype = p_ref.dtype

    t = pl.program_id(1)

    # --- width upsample + pad for all halo rows of this tile: ONE MXU op ----
    # The slab covers padded-original rows [t*HT2, t*HT2 + HT2 + 2), channel-
    # minor, so a single contiguous 2-D slice feeds a single matmul.
    start = t * (HT2 * cin)
    if (HT2 * cin) % 8 == 0:
        start = pl.multiple_of(start, 8)
    slab = x_ref[0, pl.ds(start, (HT2 + 2) * cin), :]       # ((HT2+2)*Cin, W)
    # `sup` is an exact 0/1 selection -> the bf16 result equals the bf16 input.
    uslab = jnp.dot(slab, sup_ref[...],
                    preferred_element_type=jnp.float32).astype(cdtype)

    # --- pack the im2col patch matrix ----------------------------------------
    #   P[(kh*3+kw)*Cin + ci, m*W2 + c] = upsampled-padded row (t*TH+m+kh-1),
    #                                     channel ci, padded column (c + kw).
    # Halo / pad rows are already zero (pre-padded input), so no masking is
    # needed, and the packed layout has NO garbage columns: the matmul result
    # below is exactly the output tile (single dense store, no drop loop).
    for s in range(HT2 + 2):                       # source (width-upsampled) row
        row = uslab[s * cin:(s + 1) * cin, :]      # (Cin, WP)
        segs = [row[:, kw:kw + W2] for kw in range(3)]
        for r in (2 * s - 1, 2 * s):               # halo rows fed by this source
            if not (0 <= r <= TH + 1):
                continue
            for kh in range(3):
                m = r - kh                         # output row using halo row r
                if 0 <= m < TH:
                    for kw in range(3):
                        tap = kh * 3 + kw
                        p_ref[tap * cin:(tap + 1) * cin,
                              m * W2:(m + 1) * W2] = segs[kw]

    # --- single MXU matmul, contraction depth 9*Cin, f32 accumulation --------
    y = jnp.dot(w9_ref[...], p_ref[...],
                preferred_element_type=jnp.float32)          # (Cout, TH*W2)

    # NOTE: conv bias intentionally omitted -- a per-channel constant added
    # before training-mode BatchNorm is exactly normalized away.
    o_ref[0, :, :] = y.astype(o_ref.dtype)

    # --- BN partial statistics from the f32 result (before the bf16 cast) ----
    # Centered per block -> no E[x^2]-E[x]^2 cancellation; combined Welford-
    # style in the wrapper.  Cout stays on the sublane axis to match the
    # reduction layout (O(Cout) data, a single tiny store).
    ssum = jnp.sum(y, axis=-1, keepdims=True)                # (Cout, 1)
    mu = ssum * (1.0 / lw)
    m2 = jnp.sum(jnp.square(y - mu), axis=-1, keepdims=True)  # (Cout, 1)
    stats_ref[0, 0, :, 0:1] = ssum
    stats_ref[0, 0, :, 1:2] = m2


def _bn_relu_kernel(x_ref, scale_ref, shift_ref, o_ref):
    """Apply precomputed BN scale/shift + ReLU on a large lane-dense chunk."""
    x = x_ref[0].astype(jnp.float32)                         # (Cout, CS)
    o_ref[0] = jnp.maximum(x * scale_ref[...] + shift_ref[...], 0.0)


# ----------------------------------------------------------------------------
# Tiling helpers (VMEM- and generation-aware)
# ----------------------------------------------------------------------------
def _round_up(v, m):
    return ((v + m - 1) // m) * m


def _buf_bytes(rows, cols, itemsize):
    """Approximate padded VMEM footprint of a (rows, cols) buffer."""
    return _round_up(rows, 8) * _round_up(cols, 128) * itemsize


def _conv_footprint(th, H, W, Cin, Cout, cb, ob):
    """Approximate per-step VMEM bytes of the conv kernel at row tile `th`."""
    W2, WP = 2 * W, 2 * W + 2
    ht2, lw = th // 2, th * 2 * W
    f = 0
    f += 2 * _buf_bytes((H + 2) * Cin, W, cb)       # x block (double buffered)
    f += 2 * _buf_bytes(Cout, 9 * Cin, cb)          # packed weights
    f += 2 * _buf_bytes(W, WP, cb)                  # upsample matrix
    f += 2 * _buf_bytes(Cout, lw, ob)               # conv output block
    f += 2 * _buf_bytes(Cout, 2, 4)                 # stats block
    f += _buf_bytes(9 * Cin, lw, cb)                # P scratch
    f += _buf_bytes((ht2 + 2) * Cin, WP, 4 + cb)    # uslab f32 + bf16 temps
    f += _buf_bytes(Cout, lw, 4)                    # f32 matmul result temp
    return f


def _pick_row_tile(H2, W2, N, footprint, budget):
    """Largest even row tile that keeps blocks lane-dense and fits VMEM.

    Lane-density (th*W2 % 128 == 0) is required so the output block never
    degrades to masked partial stores; if no such divisor exists, fall back to
    the full image (th == H2), which is a legal full-dim block.
    """
    cands = [th for th in range(2, min(H2, 64) + 1, 2)
             if H2 % th == 0 and (th * W2) % 128 == 0]
    if not cands:
        return H2
    fit = [th for th in cands if footprint(th) <= budget]
    if not fit:
        fit = [min(cands, key=footprint)]

    def score(th):
        T = H2 // th
        steps = N * T
        return (
            0 if steps >= 4 else 1,                                # pipelining
            0 if (N % 2 == 0 or T % 2 == 0 or steps == 1) else 1,  # v7x 2-TC balance
            -th,                                                   # then biggest tile
        )

    return min(fit, key=score)


def _pick_bn_chunk(S, Cout, in_b, out_b, budget):
    """Largest lane-dense chunk of the flattened spatial axis for the BN pass."""
    target = min(budget // 2, 16 * 1024 * 1024)
    cap = max(128, target // max(1, 2 * Cout * (in_b + out_b)))
    if S <= cap:
        return S
    best = 0
    for cs in range(128, S + 1, 128):
        if S % cs:
            continue
        if cs <= cap:
            best = cs
        else:
            if best == 0:
                best = cs          # smallest legal chunk if none fits the target
            break
    return best if best else S


# ----------------------------------------------------------------------------
# Wrapper
# ----------------------------------------------------------------------------
@jax.jit
def up_block2d(x, w, b, gamma, beta):
    """UpBlock2d forward pass.

    x: (N, Cin, H, W) f32; w: (3, 3, Cin, Cout) HWIO; b: (Cout,) conv bias
    (ignored: a per-channel constant added before *training-mode* BatchNorm is
    exactly normalized away -- this kernel always uses batch statistics);
    gamma/beta: (Cout,).  Returns (N, Cout, 2H, 2W) f32.
    """
    del b
    N, Cin, H, W = x.shape
    KH, KW, _, Cout = w.shape
    assert (KH, KW) == (3, 3), "kernel hard-codes the 3x3 / pad=1 conv"
    H2, W2 = 2 * H, 2 * W
    WP = W2 + 2
    S = H2 * W2

    cdtype = jnp.bfloat16              # MXU inputs + conv intermediate
    cb = ob = 2                        # bytes of compute / conv-out dtype

    # Generation-aware VMEM budget (v7x: 64 MiB/TC, v5e/v6e: 128 MiB).
    try:
        vmem_cap = int(pltpu.get_tpu_info().vmem_capacity_bytes)
    except Exception:
        vmem_cap = 64 * 1024 * 1024    # conservative (v7x) default
    budget = int(vmem_cap * 0.45)
    vmem_limit = int(vmem_cap * 0.8)

    TH = _pick_row_tile(
        H2, W2, N,
        footprint=lambda th: _conv_footprint(th, H, W, Cin, Cout, cb, ob),
        budget=budget)
    T = H2 // TH

    # Pre-padded (one zero row top/bottom) input, rows grouped (h, ci) so a
    # tile's halo slab is one contiguous 2-D slice; bf16 halves HBM traffic.
    x_pad = jnp.pad(x, ((0, 0), (0, 0), (1, 1), (0, 0)))
    xr = jnp.transpose(x_pad, (0, 2, 1, 3)).reshape(
        N, (H + 2) * Cin, W).astype(cdtype)
    # Tap-major packed weights: w9[o, (kh*3+kw)*Cin + ci] = w[kh, kw, ci, o].
    w9 = jnp.transpose(w, (3, 0, 1, 2)).reshape(Cout, 9 * Cin).astype(cdtype)
    # 0/1 width nearest-2x upsample + zero pad=1 matrix (exact in bf16):
    #   sup[src, j] = 1  iff  src == (j + 1)//2 - 1   (out-of-range -> pad 0).
    col = (jnp.arange(WP) + 1) // 2 - 1
    sup = (jnp.arange(W)[:, None] == col[None, :]).astype(cdtype)

    cparams = pltpu.CompilerParams(
        dimension_semantics=("parallel", "parallel"),
        vmem_limit_bytes=vmem_limit)

    conv_flat, stats = pl.pallas_call(
        _upconv_kernel,
        out_shape=(
            jax.ShapeDtypeStruct((N, Cout, S), cdtype),
            jax.ShapeDtypeStruct((N, T, Cout, 2), jnp.float32),
        ),
        grid_spec=pltpu.PrefetchScalarGridSpec(
            num_scalar_prefetch=0,
            grid=(N, T),
            in_specs=[
                # Whole (small, pre-upsample) image stays resident per batch
                # element; row tiles reuse it so halo rows cost nothing extra.
                # TODO(synk): halo row-tiling of this block for very large images.
                pl.BlockSpec((1, (H + 2) * Cin, W), lambda n, t: (n, 0, 0)),
                pl.BlockSpec((Cout, 9 * Cin), lambda n, t: (0, 0)),
                pl.BlockSpec((W, WP), lambda n, t: (0, 0)),
            ],
            out_specs=[
                pl.BlockSpec((1, Cout, TH * W2), lambda n, t: (n, 0, t)),
                pl.BlockSpec((1, 1, Cout, 2), lambda n, t: (n, t, 0, 0)),
            ],
            scratch_shapes=[pltpu.VMEM((9 * Cin, TH * W2), cdtype)],
        ),
        compiler_params=cparams,
    )(xr, w9, sup)

    # Tiny O(C) Welford-style combine of the per-block (sum, centered M2).
    sums = stats[..., 0]                                     # (N, T, Cout)
    m2s = stats[..., 1]
    cnt_b = jnp.float32(TH * W2)
    total = jnp.float32(N * T) * cnt_b                       # == N * H2 * W2
    mean = jnp.sum(sums, axis=(0, 1)) / total                # (Cout,)
    mean_b = sums / cnt_b
    var = (jnp.sum(m2s, axis=(0, 1)) +
           cnt_b * jnp.sum(jnp.square(mean_b - mean), axis=(0, 1))) / total
    var = jnp.maximum(var, 0.0)
    inv = jax.lax.rsqrt(var + 1e-5)
    scale = (gamma * inv).astype(jnp.float32).reshape(Cout, 1)
    shift = (beta - mean * gamma * inv).astype(jnp.float32).reshape(Cout, 1)

    # Memory-bound scale/shift + ReLU pass: tiled independently with large
    # lane-dense chunks (bf16 in, f32 out).
    CS = _pick_bn_chunk(S, Cout, ob, 4, budget)
    y = pl.pallas_call(
        _bn_relu_kernel,
        out_shape=jax.ShapeDtypeStruct((N, Cout, S), jnp.float32),
        grid_spec=pltpu.PrefetchScalarGridSpec(
            num_scalar_prefetch=0,
            grid=(N, S // CS),
            in_specs=[
                pl.BlockSpec((1, Cout, CS), lambda n, c: (n, 0, c)),
                pl.BlockSpec((Cout, 1), lambda n, c: (0, 0)),
                pl.BlockSpec((Cout, 1), lambda n, c: (0, 0)),
            ],
            out_specs=pl.BlockSpec((1, Cout, CS), lambda n, c: (n, 0, c)),
        ),
        compiler_params=cparams,
    )(conv_flat, scale, shift)

    return y.reshape(N, Cout, H2, W2)


# ----------------------------------------------------------------------------
# Plain-JAX reference matching the PyTorch module semantics
# ----------------------------------------------------------------------------
def reference(x, w, b, gamma, beta):
    xu = jnp.repeat(jnp.repeat(x, 2, axis=2), 2, axis=3)     # nearest 2x
    out = jax.lax.conv_general_dilated(
        xu, w, window_strides=(1, 1), padding=((1, 1), (1, 1)),
        dimension_numbers=("NCHW", "HWIO", "NCHW"))
    out = out + b[None, :, None, None]
    mean = jnp.mean(out, axis=(0, 2, 3), keepdims=True)
    var = jnp.mean((out - mean) ** 2, axis=(0, 2, 3), keepdims=True)
    xhat = (out - mean) * jax.lax.rsqrt(var + 1e-5)
    y = xhat * gamma[None, :, None, None] + beta[None, :, None, None]
    return jnp.maximum(y, 0.0)


if __name__ == "__main__":
    key = jax.random.PRNGKey(0)
    k_x, k_w, k_b, k_g, k_beta = jax.random.split(key, 5)

    N, Cin, H, W = 2, 4, 16, 16
    Cout = 8

    x = jax.random.normal(k_x, (N, Cin, H, W), jnp.float32)
    w = jax.random.normal(k_w, (3, 3, Cin, Cout), jnp.float32) * 0.1   # HWIO
    b = jax.random.normal(k_b, (Cout,), jnp.float32) * 0.1
    gamma = 1.0 + 0.1 * jax.random.normal(k_g, (Cout,), jnp.float32)
    beta = 0.1 * jax.random.normal(k_beta, (Cout,), jnp.float32)

    out = jax.block_until_ready(up_block2d(x, w, b, gamma, beta))
    ref = reference(x, w, b, gamma, beta)

    assert out.shape == (N, Cout, 2 * H, 2 * W), out.shape
    max_err = float(jnp.max(jnp.abs(out - ref)))
    mean_err = float(jnp.mean(jnp.abs(out - ref)))
    # bf16 matmul inputs / bf16 conv intermediate -> relaxed tolerance.
    assert max_err < 1e-1 and mean_err < 1e-2, (max_err, mean_err)

    print("KERNEL_OK")
</pallas_src>

<mosaic_0001>
module attributes {stable_mosaic.version = 11 : i64} {
  func.func @_bn_relu_kernel(%arg0: i32, %arg1: i32, %arg2: memref<1x8x1024xbf16, #tpu.memory_space<vmem>>, %arg3: memref<8x1xf32, #tpu.memory_space<vmem>>, %arg4: memref<8x1xf32, #tpu.memory_space<vmem>>, %arg5: memref<1x8x1024xf32, #tpu.memory_space<vmem>>) attributes {dimension_semantics = [#tpu.dimension_semantics<parallel>, #tpu.dimension_semantics<parallel>], iteration_bounds = array<i64: 2, 1>, scalar_prefetch = 0 : i64, scratch_operands = 0 : i64, tpu.core_type = #tpu.core_type<tc>, window_params = [{transform_indices = @transform_0, window_bounds = array<i64: 1, 8, 1024>}, {pipeline_mode = #tpu.pipeline_mode<synchronous>, transform_indices = @transform_1, window_bounds = array<i64: 8, 1>}, {pipeline_mode = #tpu.pipeline_mode<synchronous>, transform_indices = @transform_2, window_bounds = array<i64: 8, 1>}, {transform_indices = @transform_3, window_bounds = array<i64: 1, 8, 1024>}]} {
    %c0 = arith.constant 0 : index
    %c0_0 = arith.constant 0 : index
    %c0_1 = arith.constant 0 : index
    %0 = vector.load %arg2[%c0, %c0_0, %c0_1] : memref<1x8x1024xbf16, #tpu.memory_space<vmem>>, vector<1x8x1024xbf16>
    %1 = vector.shape_cast %0 : vector<1x8x1024xbf16> to vector<8x1024xbf16>
    %2 = arith.extf %1 : vector<8x1024xbf16> to vector<8x1024xf32>
    %c0_2 = arith.constant 0 : index
    %c0_3 = arith.constant 0 : index
    %3 = vector.load %arg3[%c0_2, %c0_3] : memref<8x1xf32, #tpu.memory_space<vmem>>, vector<8x1xf32>
    %4 = vector.broadcast %3 : vector<8x1xf32> to vector<8x1024xf32>
    %5 = arith.mulf %2, %4 : vector<8x1024xf32>
    %c0_4 = arith.constant 0 : index
    %c0_5 = arith.constant 0 : index
    %6 = vector.load %arg4[%c0_4, %c0_5] : memref<8x1xf32, #tpu.memory_space<vmem>>, vector<8x1xf32>
    %7 = vector.broadcast %6 : vector<8x1xf32> to vector<8x1024xf32>
    %8 = arith.addf %5, %7 : vector<8x1024xf32>
    %cst = arith.constant 0.000000e+00 : f32
    %9 = vector.broadcast %cst : f32 to vector<8x1024xf32>
    %10 = arith.maximumf %8, %9 : vector<8x1024xf32>
    %c0_6 = arith.constant 0 : index
    %c0_7 = arith.constant 0 : index
    %c0_8 = arith.constant 0 : index
    %11 = vector.load %arg5[%c0_6, %c0_7, %c0_8] : memref<1x8x1024xf32, #tpu.memory_space<vmem>>, vector<1x8x1024xf32>
    %12 = vector.shape_cast %11 : vector<1x8x1024xf32> to vector<8x1024xf32>
    %13 = vector.shape_cast %10 : vector<8x1024xf32> to vector<1x8x1024xf32>
    tpu.vector_store %arg5[%c0_6, %c0_7, %c0_8], %13 {strides = array<i32>} : memref<1x8x1024xf32, #tpu.memory_space<vmem>>, vector<1x8x1024xf32>,
    return
  }
  func.func @transform_0(%arg0: i32, %arg1: i32) -> (i32, i32, i32) {
    %c0_i32 = arith.constant 0 : i32
    %c0_i32_0 = arith.constant 0 : i32
    return %arg0, %c0_i32, %arg1 : i32, i32, i32
  }
  func.func @transform_1(%arg0: i32, %arg1: i32) -> (i32, i32) {
    %c0_i32 = arith.constant 0 : i32
    %c0_i32_0 = arith.constant 0 : i32
    %c0_i32_1 = arith.constant 0 : i32
    return %c0_i32, %c0_i32_0 : i32, i32
  }
  func.func @transform_2(%arg0: i32, %arg1: i32) -> (i32, i32) {
    %c0_i32 = arith.constant 0 : i32
    %c0_i32_0 = arith.constant 0 : i32
    %c0_i32_1 = arith.constant 0 : i32
    return %c0_i32, %c0_i32_0 : i32, i32
  }
  func.func @transform_3(%arg0: i32, %arg1: i32) -> (i32, i32, i32) {
    %c0_i32 = arith.constant 0 : i32
    %c0_i32_0 = arith.constant 0 : i32
    return %arg0, %c0_i32, %arg1 : i32, i32, i32
  }
}

module attributes {stable_mosaic.version = 11 : i64} {
  func.func @_upconv_kernel(%arg0: i32, %arg1: i32, %arg2: memref<1x72x16xbf16, #tpu.memory_space<vmem>>, %arg3: memref<8x36xbf16, #tpu.memory_space<vmem>>, %arg4: memref<16x34xbf16, #tpu.memory_space<vmem>>, %arg5: memref<1x8x512xbf16, #tpu.memory_space<vmem>>, %arg6: memref<1x1x8x2xf32, #tpu.memory_space<vmem>>, %arg7: memref<36x512xbf16, #tpu.memory_space<vmem>>) attributes {dimension_semantics = [#tpu.dimension_semantics<parallel>, #tpu.dimension_semantics<parallel>], iteration_bounds = array<i64: 2, 2>, scalar_prefetch = 0 : i64, scratch_operands = 1 : i64, tpu.core_type = #tpu.core_type<tc>, window_params = [{transform_indices = @transform_0, window_bounds = array<i64: 1, 72, 16>}, {pipeline_mode = #tpu.pipeline_mode<synchronous>, transform_indices = @transform_1, window_bounds = array<i64: 8, 36>}, {pipeline_mode = #tpu.pipeline_mode<synchronous>, transform_indices = @transform_2, window_bounds = array<i64: 16, 34>}, {transform_indices = @transform_3, window_bounds = array<i64: 1, 8, 512>}, {transform_indices = @transform_4, window_bounds = array<i64: 1, 1, 8, 2>}]} {
    %c32_i32 = arith.constant 32 : i32
    %0 = arith.muli %arg1, %c32_i32 : i32
    %1 = tpu.assume_multiple %0, 8 : i32
    %c0 = arith.constant 0 : index
    %2 = arith.index_cast %1 : i32 to index
    %c0_0 = arith.constant 0 : index
    %3 = vector.load %arg2[%c0, %2, %c0_0] : memref<1x72x16xbf16, #tpu.memory_space<vmem>>, vector<1x40x16xbf16>
    %4 = vector.shape_cast %3 : vector<1x40x16xbf16> to vector<40x16xbf16>
    %c0_1 = arith.constant 0 : index
    %c0_2 = arith.constant 0 : index
    %5 = vector.load %arg4[%c0_1, %c0_2] : memref<16x34xbf16, #tpu.memory_space<vmem>>, vector<16x34xbf16>
    %cst = arith.constant dense<0.000000e+00> : vector<40x34xf32>
    %6 = tpu.matmul %4, %5, %cst {dimension_numbers = #tpu.dot_dimension_numbers<[1], [0], [0], [1], [0, 0, 1, 1], [], []>} : vector<40x16xbf16>, vector<16x34xbf16>, vector<40x34xf32> -> vector<40x34xf32>
    %7 = arith.truncf %6 : vector<40x34xf32> to vector<40x34xbf16>
    %8 = vector.extract_strided_slice %7 {offsets = [0, 0], sizes = [4, 34], strides = [1, 1]} : vector<40x34xbf16> to vector<4x34xbf16>
    %9 = vector.extract_strided_slice %8 {offsets = [0, 0], sizes = [4, 32], strides = [1, 1]} : vector<4x34xbf16> to vector<4x32xbf16>
    %10 = vector.extract_strided_slice %8 {offsets = [0, 1], sizes = [4, 32], strides = [1, 1]} : vector<4x34xbf16> to vector<4x32xbf16>
    %11 = vector.extract_strided_slice %8 {offsets = [0, 2], sizes = [4, 32], strides = [1, 1]} : vector<4x34xbf16> to vector<4x32xbf16>
    %c0_3 = arith.constant 0 : index
    %c0_4 = arith.constant 0 : index
    %12 = vector.load %arg7[%c0_3, %c0_4] : memref<36x512xbf16, #tpu.memory_space<vmem>>, vector<4x32xbf16>
    tpu.vector_store %arg7[%c0_3, %c0_4], %9 {strides = array<i32>} : memref<36x512xbf16, #tpu.memory_space<vmem>>, vector<4x32xbf16>,
    %c4 = arith.constant 4 : index
    %c0_5 = arith.constant 0 : index
    %13 = vector.load %arg7[%c4, %c0_5] : memref<36x512xbf16, #tpu.memory_space<vmem>>, vector<4x32xbf16>
    tpu.vector_store %arg7[%c4, %c0_5], %10 {strides = array<i32>} : memref<36x512xbf16, #tpu.memory_space<vmem>>, vector<4x32xbf16>,
    %c8 = arith.constant 8 : index
    %c0_6 = arith.constant 0 : index
    %14 = vector.load %arg7[%c8, %c0_6] : memref<36x512xbf16, #tpu.memory_space<vmem>>, vector<4x32xbf16>
    tpu.vector_store %arg7[%c8, %c0_6], %11 {strides = array<i32>} : memref<36x512xbf16, #tpu.memory_space<vmem>>, vector<4x32xbf16>,
    %15 = vector.extract_strided_slice %7 {offsets = [4, 0], sizes = [4, 34], strides = [1, 1]} : vector<40x34xbf16> to vector<4x34xbf16>
    %16 = vector.extract_strided_slice %15 {offsets = [0, 0], sizes = [4, 32], strides = [1, 1]} : vector<4x34xbf16> to vector<4x32xbf16>
    %17 = vector.extract_strided_slice %15 {offsets = [0, 1], sizes = [4, 32], strides = [1, 1]} : vector<4x34xbf16> to vector<4x32xbf16>
    %18 = vector.extract_strided_slice %15 {offsets = [0, 2], sizes = [4, 32], strides = [1, 1]} : vector<4x34xbf16> to vector<4x32xbf16>
    %c0_7 = arith.constant 0 : index
    %c32 = arith.constant 32 : index
    %19 = vector.load %arg7[%c0_7, %c32] : memref<36x512xbf16, #tpu.memory_space<vmem>>, vector<4x32xbf16>
    tpu.vector_store %arg7[%c0_7, %c32], %16 {strides = array<i32>} : memref<36x512xbf16, #tpu.memory_space<vmem>>, vector<4x32xbf16>,
    %c4_8 = arith.constant 4 : index
    %c32_9 = arith.constant 32 : index
    %20 = vector.load %arg7[%c4_8, %c32_9] : memref<36x512xbf16, #tpu.memory_space<vmem>>, vector<4x32xbf16>
    tpu.vector_store %arg7[%c4_8, %c32_9], %17 {strides = array<i32>} : memref<36x512xbf16, #tpu.memory_space<vmem>>, vector<4x32xbf16>,
    %c8_10 = arith.constant 8 : index
    %c32_11 = arith.constant 32 : index
    %21 = vector.load %arg7[%c8_10, %c32_11] : memref<36x512xbf16, #tpu.memory_space<vmem>>, vector<4x32xbf16>
    tpu.vector_store %arg7[%c8_10, %c32_11], %18 {strides = array<i32>} : memref<36x512xbf16, #tpu.memory_space<vmem>>, vector<4x32xbf16>,
    %c12 = arith.constant 12 : index
    %c0_12 = arith.constant 0 : index
    %22 = vector.load %arg7[%c12, %c0_12] : memref<36x512xbf16, #tpu.memory_space<vmem>>, vector<4x32xbf16>
    tpu.vector_store %arg7[%c12, %c0_12], %16 {strides = array<i32>} : memref<36x512xbf16, #tpu.memory_space<vmem>>, vector<4x32xbf16>,
    %c16 = arith.constant 16 : index
    %c0_13 = arith.constant 0 : index
    %23 = vector.load %arg7[%c16, %c0_13] : memref<36x512xbf16, #tpu.memory_space<vmem>>, vector<4x32xbf16>
    tpu.vector_store %arg7[%c16, %c0_13], %17 {strides = array<i32>} : memref<36x512xbf16, #tpu.memory_space<vmem>>, vector<4x32xbf16>,
    %c20 = arith.constant 20 : index
    %c0_14 = arith.constant 0 : index
    %24 = vector.load %arg7[%c20, %c0_14] : memref<36x512xbf16, #tpu.memory_space<vmem>>, vector<4x32xbf16>
    tpu.vector_store %arg7[%c20, %c0_14], %18 {strides = array<i32>} : memref<36x512xbf16, #tpu.memory_space<vmem>>, vector<4x32xbf16>,
    %c0_15 = arith.constant 0 : index
    %c64 = arith.constant 64 : index
    %25 = vector.load %arg7[%c0_15, %c64] : memref<36x512xbf16, #tpu.memory_space<vmem>>, vector<4x32xbf16>
    tpu.vector_store %arg7[%c0_15, %c64], %16 {strides = array<i32>} : memref<36x512xbf16, #tpu.memory_space<vmem>>, vector<4x32xbf16>,
    %c4_16 = arith.constant 4 : index
    %c64_17 = arith.constant 64 : index
    %26 = vector.load %arg7[%c4_16, %c64_17] : memref<36x512xbf16, #tpu.memory_space<vmem>>, vector<4x32xbf16>
    tpu.vector_store %arg7[%c4_16, %c64_17], %17 {strides = array<i32>} : memref<36x512xbf16, #tpu.memory_space<vmem>>, vector<4x32xbf16>,
    %c8_18 = arith.constant 8 : index
    %c64_19 = arith.constant 64 : index
    %27 = vector.load %arg7[%c8_18, %c64_19] : memref<36x512xbf16, #tpu.memory_space<vmem>>, vector<4x32xbf16>
    tpu.vector_store %arg7[%c8_18, %c64_19], %18 {strides = array<i32>} : memref<36x512xbf16, #tpu.memory_space<vmem>>, vector<4x32xbf16>,
    %c12_20 = arith.constant 12 : index
    %c32_21 = arith.constant 32 : index
    %28 = vector.load %arg7[%c12_20, %c32_21] : memref<36x512xbf16, #tpu.memory_space<vmem>>, vector<4x32xbf16>
    tpu.vector_store %arg7[%c12_20, %c32_21], %16 {strides = array<i32>} : memref<36x512xbf16, #tpu.memory_space<vmem>>, vector<4x32xbf16>,
    %c16_22 = arith.constant 16 : index
    %c32_23 = arith.constant 32 : index
    %29 = vector.load %arg7[%c16_22, %c32_23] : memref<36x512xbf16, #tpu.memory_space<vmem>>, vector<4x32xbf16>
    tpu.vector_store %arg7[%c16_22, %c32_23], %17 {strides = array<i32>} : memref<36x512xbf16, #tpu.memory_space<vmem>>, vector<4x32xbf16>,
    %c20_24 = arith.constant 20 : index
    %c32_25 = arith.constant 32 : index
    %30 = vector.load %arg7[%c20_24, %c32_25] : memref<36x512xbf16, #tpu.memory_space<vmem>>, vector<4x32xbf16>
    tpu.vector_store %arg7[%c20_24, %c32_25], %18 {strides = array<i32>} : memref<36x512xbf16, #tpu.memory_space<vmem>>, vector<4x32xbf16>,
    %c24 = arith.constant 24 : index
    %c0_26 = arith.constant 0 : index
    %31 = vector.load %arg7[%c24, %c0_26] : memref<36x512xbf16, #tpu.memory_space<vmem>>, vector<4x32xbf16>
    tpu.vector_store %arg7[%c24, %c0_26], %16 {strides = array<i32>} : memref<36x512xbf16, #tpu.memory_space<vmem>>, vector<4x32xbf16>,
    %c28 = arith.constant 28 : index
    %c0_27 = arith.constant 0 : index
    %32 = vector.load %arg7[%c28, %c0_27] : memref<36x512xbf16, #tpu.memory_space<vmem>>, vector<4x32xbf16>
    tpu.vector_store %arg7[%c28, %c0_27], %17 {strides = array<i32>} : memref<36x512xbf16, #tpu.memory_space<vmem>>, vector<4x32xbf16>,
    %c32_28 = arith.constant 32 : index
    %c0_29 = arith.constant 0 : index
    %33 = vector.load %arg7[%c32_28, %c0_29] : memref<36x512xbf16, #tpu.memory_space<vmem>>, vector<4x32xbf16>
    tpu.vector_store %arg7[%c32_28, %c0_29], %18 {strides = array<i32>} : memref<36x512xbf16, #tpu.memory_space<vmem>>, vector<4x32xbf16>,
    %34 = vector.extract_strided_slice %7 {offsets = [8, 0], sizes = [4, 34], strides = [1, 1]} : vector<40x34xbf16> to vector<4x34xbf16>
    %35 = vector.extract_strided_slice %34 {offsets = [0, 0], sizes = [4, 32], strides = [1, 1]} : vector<4x34xbf16> to vector<4x32xbf16>
    %36 = vector.extract_strided_slice %34 {offsets = [0, 1], sizes = [4, 32], strides = [1, 1]} : vector<4x34xbf16> to vector<4x32xbf16>
    %37 = vector.extract_strided_slice %34 {offsets = [0, 2], sizes = [4, 32], strides = [1, 1]} : vector<4x34xbf16> to vector<4x32xbf16>
    %c0_30 = arith.constant 0 : index
    %c96 = arith.constant 96 : index
    %38 = vector.load %arg7[%c0_30, %c96] : memref<36x512xbf16, #tpu.memory_space<vmem>>, vector<4x32xbf16>
    tpu.vector_store %arg7[%c0_30, %c96], %35 {strides = array<i32>} : memref<36x512xbf16, #tpu.memory_space<vmem>>, vector<4x32xbf16>,
    %c4_31 = arith.constant 4 : index
    %c96_32 = arith.constant 96 : index
    %39 = vector.load %arg7[%c4_31, %c96_32] : memref<36x512xbf16, #tpu.memory_space<vmem>>, vector<4x32xbf16>
    tpu.vector_store %arg7[%c4_31, %c96_32], %36 {strides = array<i32>} : memref<36x512xbf16, #tpu.memory_space<vmem>>, vector<4x32xbf16>,
    %c8_33 = arith.constant 8 : index
    %c96_34 = arith.constant 96 : index
    %40 = vector.load %arg7[%c8_33, %c96_34] : memref<36x512xbf16, #tpu.memory_space<vmem>>, vector<4x32xbf16>
    tpu.vector_store %arg7[%c8_33, %c96_34], %37 {strides = array<i32>} : memref<36x512xbf16, #tpu.memory_space<vmem>>, vector<4x32xbf16>,
    %c12_35 = arith.constant 12 : index
    %c64_36 = arith.constant 64 : index
    %41 = vector.load %arg7[%c12_35, %c64_36] : memref<36x512xbf16, #tpu.memory_space<vmem>>, vector<4x32xbf16>
    tpu.vector_store %arg7[%c12_35, %c64_36], %35 {strides = array<i32>} : memref<36x512xbf16, #tpu.memory_space<vmem>>, vector<4x32xbf16>,
    %c16_37 = arith.constant 16 : index
    %c64_38 = arith.constant 64 : index
    %42 = vector.load %arg7[%c16_37, %c64_38] : memref<36x512xbf16, #tpu.memory_space<vmem>>, vector<4x32xbf16>
    tpu.vector_store %arg7[%c16_37, %c64_38], %36 {strides = array<i32>} : memref<36x512xbf16, #tpu.memory_space<vmem>>, vector<4x32xbf16>,
    %c20_39 = arith.constant 20 : index
    %c64_40 = arith.constant 64 : index
    %43 = vector.load %arg7[%c20_39, %c64_40] : memref<36x512xbf16, #tpu.memory_space<vmem>>, vector<4x32xbf16>
    tpu.vector_store %arg7[%c20_39, %c64_40], %37 {strides = array<i32>} : memref<36x512xbf16, #tpu.memory_space<vmem>>, vector<4x32xbf16>,
    %c24_41 = arith.constant 24 : index
    %c32_42 = arith.constant 32 : index
    %44 = vector.load %arg7[%c24_41, %c32_42] : memref<36x512xbf16, #tpu.memory_space<vmem>>, vector<4x32xbf16>
    tpu.vector_store %arg7[%c24_41, %c32_42], %35 {strides = array<i32>} : memref<36x512xbf16, #tpu.memory_space<vmem>>, vector<4x32xbf16>,
    %c28_43 = arith.constant 28 : index
    %c32_44 = arith.constant 32 : index
    %45 = vector.load %arg7[%c28_43, %c32_44] : memref<36x512xbf16, #tpu.memory_space<vmem>>, vector<4x32xbf16>
    tpu.vector_store %arg7[%c28_43, %c32_44], %36 {strides = array<i32>} : memref<36x512xbf16, #tpu.memory_space<vmem>>, vector<4x32xbf16>,
    %c32_45 = arith.constant 32 : index
    %c32_46 = arith.constant 32 : index
    %46 = vector.load %arg7[%c32_45, %c32_46] : memref<36x512xbf16, #tpu.memory_space<vmem>>, vector<4x32xbf16>
    tpu.vector_store %arg7[%c32_45, %c32_46], %37 {strides = array<i32>} : memref<36x512xbf16, #tpu.memory_space<vmem>>, vector<4x32xbf16>,
    %c0_47 = arith.constant 0 : index
    %c128 = arith.constant 128 : index
    %47 = vector.load %arg7[%c0_47, %c128] : memref<36x512xbf16, #tpu.memory_space<vmem>>, vector<4x32xbf16>
    tpu.vector_store %arg7[%c0_47, %c128], %35 {strides = array<i32>} : memref<36x512xbf16, #tpu.memory_space<vmem>>, vector<4x32xbf16>,
    %c4_48 = arith.constant 4 : index
    %c128_49 = arith.constant 128 : index
    %48 = vector.load %arg7[%c4_48, %c128_49] : memref<36x512xbf16, #tpu.memory_space<vmem>>, vector<4x32xbf16>
    tpu.vector_store %arg7[%c4_48, %c128_49], %36 {strides = array<i32>} : memref<36x512xbf16, #tpu.memory_space<vmem>>, vector<4x32xbf16>,
    %c8_50 = arith.constant 8 : index
    %c128_51 = arith.constant 128 : index
    %49 = vector.load %arg7[%c8_50, %c128_51] : memref<36x512xbf16, #tpu.memory_space<vmem>>, vector<4x32xbf16>
    tpu.vector_store %arg7[%c8_50, %c128_51], %37 {strides = array<i32>} : memref<36x512xbf16, #tpu.memory_space<vmem>>, vector<4x32xbf16>,
    %c12_52 = arith.constant 12 : index
    %c96_53 = arith.constant 96 : index
    %50 = vector.load %arg7[%c12_52, %c96_53] : memref<36x512xbf16, #tpu.memory_space<vmem>>, vector<4x32xbf16>
    tpu.vector_store %arg7[%c12_52, %c96_53], %35 {strides = array<i32>} : memref<36x512xbf16, #tpu.memory_space<vmem>>, vector<4x32xbf16>,
    %c16_54 = arith.constant 16 : index
    %c96_55 = arith.constant 96 : index
    %51 = vector.load %arg7[%c16_54, %c96_55] : memref<36x512xbf16, #tpu.memory_space<vmem>>, vector<4x32xbf16>
    tpu.vector_store %arg7[%c16_54, %c96_55], %36 {strides = array<i32>} : memref<36x512xbf16, #tpu.memory_space<vmem>>, vector<4x32xbf16>,
    %c20_56 = arith.constant 20 : index
    %c96_57 = arith.constant 96 : index
    %52 = vector.load %arg7[%c20_56, %c96_57] : memref<36x512xbf16, #tpu.memory_space<vmem>>, vector<4x32xbf16>
    tpu.vector_store %arg7[%c20_56, %c96_57], %37 {strides = array<i32>} : memref<36x512xbf16, #tpu.memory_space<vmem>>, vector<4x32xbf16>,
    %c24_58 = arith.constant 24 : index
    %c64_59 = arith.constant 64 : index
    %53 = vector.load %arg7[%c24_58, %c64_59] : memref<36x512xbf16, #tpu.memory_space<vmem>>, vector<4x32xbf16>
    tpu.vector_store %arg7[%c24_58, %c64_59], %35 {strides = array<i32>} : memref<36x512xbf16, #tpu.memory_space<vmem>>, vector<4x32xbf16>,
    %c28_60 = arith.constant 28 : index
    %c64_61 = arith.constant 64 : index
    %54 = vector.load %arg7[%c28_60, %c64_61] : memref<36x512xbf16, #tpu.memory_space<vmem>>, vector<4x32xbf16>
    tpu.vector_store %arg7[%c28_60, %c64_61], %36 {strides = array<i32>} : memref<36x512xbf16, #tpu.memory_space<vmem>>, vector<4x32xbf16>,
    %c32_62 = arith.constant 32 : index
    %c64_63 = arith.constant 64 : index
    %55 = vector.load %arg7[%c32_62, %c64_63] : memref<36x512xbf16, #tpu.memory_space<vmem>>, vector<4x32xbf16>
    tpu.vector_store %arg7[%c32_62, %c64_63], %37 {strides = array<i32>} : memref<36x512xbf16, #tpu.memory_space<vmem>>, vector<4x32xbf16>,
    %56 = vector.extract_strided_slice %7 {offsets = [12, 0], sizes = [4, 34], strides = [1, 1]} : vector<40x34xbf16> to vector<4x34xbf16>
    %57 = vector.extract_strided_slice %56 {offsets = [0, 0], sizes = [4, 32], strides = [1, 1]} : vector<4x34xbf16> to vector<4x32xbf16>
    %58 = vector.extract_strided_slice %56 {offsets = [0, 1], sizes = [4, 32], strides = [1, 1]} : vector<4x34xbf16> to vector<4x32xbf16>
    %59 = vector.extract_strided_slice %56 {offsets = [0, 2], sizes = [4, 32], strides = [1, 1]} : vector<4x34xbf16> to vector<4x32xbf16>
    %c0_64 = arith.constant 0 : index
    %c160 = arith.constant 160 : index
    %60 = vector.load %arg7[%c0_64, %c160] : memref<36x512xbf16, #tpu.memory_space<vmem>>, vector<4x32xbf16>
    tpu.vector_store %arg7[%c0_64, %c160], %57 {strides = array<i32>} : memref<36x512xbf16, #tpu.memory_space<vmem>>, vector<4x32xbf16>,
    %c4_65 = arith.constant 4 : index
    %c160_66 = arith.constant 160 : index
    %61 = vector.load %arg7[%c4_65, %c160_66] : memref<36x512xbf16, #tpu.memory_space<vmem>>, vector<4x32xbf16>
    tpu.vector_store %arg7[%c4_65, %c160_66], %58 {strides = array<i32>} : memref<36x512xbf16, #tpu.memory_space<vmem>>, vector<4x32xbf16>,
    %c8_67 = arith.constant 8 : index
    %c160_68 = arith.constant 160 : index
    %62 = vector.load %arg7[%c8_67, %c160_68] : memref<36x512xbf16, #tpu.memory_space<vmem>>, vector<4x32xbf16>
    tpu.vector_store %arg7[%c8_67, %c160_68], %59 {strides = array<i32>} : memref<36x512xbf16, #tpu.memory_space<vmem>>, vector<4x32xbf16>,
    %c12_69 = arith.constant 12 : index
    %c128_70 = arith.constant 128 : index
    %63 = vector.load %arg7[%c12_69, %c128_70] : memref<36x512xbf16, #tpu.memory_space<vmem>>, vector<4x32xbf16>
    tpu.vector_store %arg7[%c12_69, %c128_70], %57 {strides = array<i32>} : memref<36x512xbf16, #tpu.memory_space<vmem>>, vector<4x32xbf16>,
    %c16_71 = arith.constant 16 : index
    %c128_72 = arith.constant 128 : index
    %64 = vector.load %arg7[%c16_71, %c128_72] : memref<36x512xbf16, #tpu.memory_space<vmem>>, vector<4x32xbf16>
    tpu.vector_store %arg7[%c16_71, %c128_72], %58 {strides = array<i32>} : memref<36x512xbf16, #tpu.memory_space<vmem>>, vector<4x32xbf16>,
    %c20_73 = arith.constant 20 : index
    %c128_74 = arith.constant 128 : index
    %65 = vector.load %arg7[%c20_73, %c128_74] : memref<36x512xbf16, #tpu.memory_space<vmem>>, vector<4x32xbf16>
    tpu.vector_store %arg7[%c20_73, %c128_74], %59 {strides = array<i32>} : memref<36x512xbf16, #tpu.memory_space<vmem>>, vector<4x32xbf16>,
    %c24_75 = arith.constant 24 : index
    %c96_76 = arith.constant 96 : index
    %66 = vector.load %arg7[%c24_75, %c96_76] : memref<36x512xbf16, #tpu.memory_space<vmem>>, vector<4x32xbf16>
    tpu.vector_store %arg7[%c24_75, %c96_76], %57 {strides = array<i32>} : memref<36x512xbf16, #tpu.memory_space<vmem>>, vector<4x32xbf16>,
    %c28_77 = arith.constant 28 : index
    %c96_78 = arith.constant 96 : index
    %67 = vector.load %arg7[%c28_77, %c96_78] : memref<36x512xbf16, #tpu.memory_space<vmem>>, vector<4x32xbf16>
    tpu.vector_store %arg7[%c28_77, %c96_78], %58 {strides = array<i32>} : memref<36x512xbf16, #tpu.memory_space<vmem>>, vector<4x32xbf16>,
    %c32_79 = arith.constant 32 : index
    %c96_80 = arith.constant 96 : index
    %68 = vector.load %arg7[%c32_79, %c96_80] : memref<36x512xbf16, #tpu.memory_space<vmem>>, vector<4x32xbf16>
    tpu.vector_store %arg7[%c32_79, %c96_80], %59 {strides = array<i32>} : memref<36x512xbf16, #tpu.memory_space<vmem>>, vector<4x32xbf16>,
    %c0_81 = arith.constant 0 : index
    %c192 = arith.constant 192 : index
    %69 = vector.load %arg7[%c0_81, %c192] : memref<36x512xbf16, #tpu.memory_space<vmem>>, vector<4x32xbf16>
    tpu.vector_store %arg7[%c0_81, %c192], %57 {strides = array<i32>} : memref<36x512xbf16, #tpu.memory_space<vmem>>, vector<4x32xbf16>,
    %c4_82 = arith.constant 4 : index
    %c192_83 = arith.constant 192 : index
    %70 = vector.load %arg7[%c4_82, %c192_83] : memref<36x512xbf16, #tpu.memory_space<vmem>>, vector<4x32xbf16>
    tpu.vector_store %arg7[%c4_82, %c192_83], %58 {strides = array<i32>} : memref<36x512xbf16, #tpu.memory_space<vmem>>, vector<4x32xbf16>,
    %c8_84 = arith.constant 8 : index
    %c192_85 = arith.constant 192 : index
    %71 = vector.load %arg7[%c8_84, %c192_85] : memref<36x512xbf16, #tpu.memory_space<vmem>>, vector<4x32xbf16>
    tpu.vector_store %arg7[%c8_84, %c192_85], %59 {strides = array<i32>} : memref<36x512xbf16, #tpu.memory_space<vmem>>, vector<4x32xbf16>,
    %c12_86 = arith.constant 12 : index
    %c160_87 = arith.constant 160 : index
    %72 = vector.load %arg7[%c12_86, %c160_87] : memref<36x512xbf16, #tpu.memory_space<vmem>>, vector<4x32xbf16>
    tpu.vector_store %arg7[%c12_86, %c160_87], %57 {strides = array<i32>} : memref<36x512xbf16, #tpu.memory_space<vmem>>, vector<4x32xbf16>,
    %c16_88 = arith.constant 16 : index
    %c160_89 = arith.constant 160 : index
    %73 = vector.load %arg7[%c16_88, %c160_89] : memref<36x512xbf16, #tpu.memory_space<vmem>>, vector<4x32xbf16>
    tpu.vector_store %arg7[%c16_88, %c160_89], %58 {strides = array<i32>} : memref<36x512xbf16, #tpu.memory_space<vmem>>, vector<4x32xbf16>,
    %c20_90 = arith.constant 20 : index
    %c160_91 = arith.constant 160 : index
    %74 = vector.load %arg7[%c20_90, %c160_91] : memref<36x512xbf16, #tpu.memory_space<vmem>>, vector<4x32xbf16>
    tpu.vector_store %arg7[%c20_90, %c160_91], %59 {strides = array<i32>} : memref<36x512xbf16, #tpu.memory_space<vmem>>, vector<4x32xbf16>,
    %c24_92 = arith.constant 24 : index
    %c128_93 = arith.constant 128 : index
    %75 = vector.load %arg7[%c24_92, %c128_93] : memref<36x512xbf16, #tpu.memory_space<vmem>>, vector<4x32xbf16>
    tpu.vector_store %arg7[%c24_92, %c128_93], %57 {strides = array<i32>} : memref<36x512xbf16, #tpu.memory_space<vmem>>, vector<4x32xbf16>,
    %c28_94 = arith.constant 28 : index
    %c128_95 = arith.constant 128 : index
    %76 = vector.load %arg7[%c28_94, %c128_95] : memref<36x512xbf16, #tpu.memory_space<vmem>>, vector<4x32xbf16>
    tpu.vector_store %arg7[%c28_94, %c128_95], %58 {strides = array<i32>} : memref<36x512xbf16, #tpu.memory_space<vmem>>, vector<4x32xbf16>,
    %c32_96 = arith.constant 32 : index
    %c128_97 = arith.constant 128 : index
    %77 = vector.load %arg7[%c32_96, %c128_97] : memref<36x512xbf16, #tpu.memory_space<vmem>>, vector<4x32xbf16>
    tpu.vector_store %arg7[%c32_96, %c128_97], %59 {strides = array<i32>} : memref<36x512xbf16, #tpu.memory_space<vmem>>, vector<4x32xbf16>,
    %78 = vector.extract_strided_slice %7 {offsets = [16, 0], sizes = [4, 34], strides = [1, 1]} : vector<40x34xbf16> to vector<4x34xbf16>
    %79 = vector.extract_strided_slice %78 {offsets = [0, 0], sizes = [4, 32], strides = [1, 1]} : vector<4x34xbf16> to vector<4x32xbf16>
    %80 = vector.extract_strided_slice %78 {offsets = [0, 1], sizes = [4, 32], strides = [1, 1]} : vector<4x34xbf16> to vector<4x32xbf16>
    %81 = vector.extract_strided_slice %78 {offsets = [0, 2], sizes = [4, 32], strides = [1, 1]} : vector<4x34xbf16> to vector<4x32xbf16>
    %c0_98 = arith.constant 0 : index
    %c224 = arith.constant 224 : index
    %82 = vector.load %arg7[%c0_98, %c224] : memref<36x512xbf16, #tpu.memory_space<vmem>>, vector<4x32xbf16>
    tpu.vector_store %arg7[%c0_98, %c224], %79 {strides = array<i32>} : memref<36x512xbf16, #tpu.memory_space<vmem>>, vector<4x32xbf16>,
    %c4_99 = arith.constant 4 : index
    %c224_100 = arith.constant 224 : index
    %83 = vector.load %arg7[%c4_99, %c224_100] : memref<36x512xbf16, #tpu.memory_space<vmem>>, vector<4x32xbf16>
    tpu.vector_store %arg7[%c4_99, %c224_100], %80 {strides = array<i32>} : memref<36x512xbf16, #tpu.memory_space<vmem>>, vector<4x32xbf16>,
    %c8_101 = arith.constant 8 : index
    %c224_102 = arith.constant 224 : index
    %84 = vector.load %arg7[%c8_101, %c224_102] : memref<36x512xbf16, #tpu.memory_space<vmem>>, vector<4x32xbf16>
    tpu.vector_store %arg7[%c8_101, %c224_102], %81 {strides = array<i32>} : memref<36x512xbf16, #tpu.memory_space<vmem>>, vector<4x32xbf16>,
    %c12_103 = arith.constant 12 : index
    %c192_104 = arith.constant 192 : index
    %85 = vector.load %arg7[%c12_103, %c192_104] : memref<36x512xbf16, #tpu.memory_space<vmem>>, vector<4x32xbf16>
    tpu.vector_store %arg7[%c12_103, %c192_104], %79 {strides = array<i32>} : memref<36x512xbf16, #tpu.memory_space<vmem>>, vector<4x32xbf16>,
    %c16_105 = arith.constant 16 : index
    %c192_106 = arith.constant 192 : index
    %86 = vector.load %arg7[%c16_105, %c192_106] : memref<36x512xbf16, #tpu.memory_space<vmem>>, vector<4x32xbf16>
    tpu.vector_store %arg7[%c16_105, %c192_106], %80 {strides = array<i32>} : memref<36x512xbf16, #tpu.memory_space<vmem>>, vector<4x32xbf16>,
    %c20_107 = arith.constant 20 : index
    %c192_108 = arith.constant 192 : index
    %87 = vector.load %arg7[%c20_107, %c192_108] : memref<36x512xbf16, #tpu.memory_space<vmem>>, vector<4x32xbf16>
    tpu.vector_store %arg7[%c20_107, %c192_108], %81 {strides = array<i32>} : memref<36x512xbf16, #tpu.memory_space<vmem>>, vector<4x32xbf16>,
    %c24_109 = arith.constant 24 : index
    %c160_110 = arith.constant 160 : index
    %88 = vector.load %arg7[%c24_109, %c160_110] : memref<36x512xbf16, #tpu.memory_space<vmem>>, vector<4x32xbf16>
    tpu.vector_store %arg7[%c24_109, %c160_110], %79 {strides = array<i32>} : memref<36x512xbf16, #tpu.memory_space<vmem>>, vector<4x32xbf16>,
    %c28_111 = arith.constant 28 : index
    %c160_112 = arith.constant 160 : index
    %89 = vector.load %arg7[%c28_111, %c160_112] : memref<36x512xbf16, #tpu.memory_space<vmem>>, vector<4x32xbf16>
    tpu.vector_store %arg7[%c28_111, %c160_112], %80 {strides = array<i32>} : memref<36x512xbf16, #tpu.memory_space<vmem>>, vector<4x32xbf16>,
    %c32_113 = arith.constant 32 : index
    %c160_114 = arith.constant 160 : index
    %90 = vector.load %arg7[%c32_113, %c160_114] : memref<36x512xbf16, #tpu.memory_space<vmem>>, vector<4x32xbf16>
    tpu.vector_store %arg7[%c32_113, %c160_114], %81 {strides = array<i32>} : memref<36x512xbf16, #tpu.memory_space<vmem>>, vector<4x32xbf16>,
    %c0_115 = arith.constant 0 : index
    %c256 = arith.constant 256 : index
    %91 = vector.load %arg7[%c0_115, %c256] : memref<36x512xbf16, #tpu.memory_space<vmem>>, vector<4x32xbf16>
    tpu.vector_store %arg7[%c0_115, %c256], %79 {strides = array<i32>} : memref<36x512xbf16, #tpu.memory_space<vmem>>, vector<4x32xbf16>,
    %c4_116 = arith.constant 4 : index
    %c256_117 = arith.constant 256 : index
    %92 = vector.load %arg7[%c4_116, %c256_117] : memref<36x512xbf16, #tpu.memory_space<vmem>>, vector<4x32xbf16>
    tpu.vector_store %arg7[%c4_116, %c256_117], %80 {strides = array<i32>} : memref<36x512xbf16, #tpu.memory_space<vmem>>, vector<4x32xbf16>,
    %c8_118 = arith.constant 8 : index
    %c256_119 = arith.constant 256 : index
    %93 = vector.load %arg7[%c8_118, %c256_119] : memref<36x512xbf16, #tpu.memory_space<vmem>>, vector<4x32xbf16>
    tpu.vector_store %arg7[%c8_118, %c256_119], %81 {strides = array<i32>} : memref<36x512xbf16, #tpu.memory_space<vmem>>, vector<4x32xbf16>,
    %c12_120 = arith.constant 12 : index
    %c224_121 = arith.constant 224 : index
    %94 = vector.load %arg7[%c12_120, %c224_121] : memref<36x512xbf16, #tpu.memory_space<vmem>>, vector<4x32xbf16>
    tpu.vector_store %arg7[%c12_120, %c224_121], %79 {strides = array<i32>} : memref<36x512xbf16, #tpu.memory_space<vmem>>, vector<4x32xbf16>,
    %c16_122 = arith.constant 16 : index
    %c224_123 = arith.constant 224 : index
    %95 = vector.load %arg7[%c16_122, %c224_123] : memref<36x512xbf16, #tpu.memory_space<vmem>>, vector<4x32xbf16>
    tpu.vector_store %arg7[%c16_122, %c224_123], %80 {strides = array<i32>} : memref<36x512xbf16, #tpu.memory_space<vmem>>, vector<4x32xbf16>,
    %c20_124 = arith.constant 20 : index
    %c224_125 = arith.constant 224 : index
    %96 = vector.load %arg7[%c20_124, %c224_125] : memref<36x512xbf16, #tpu.memory_space<vmem>>, vector<4x32xbf16>
    tpu.vector_store %arg7[%c20_124, %c224_125], %81 {strides = array<i32>} : memref<36x512xbf16, #tpu.memory_space<vmem>>, vector<4x32xbf16>,
    %c24_126 = arith.constant 24 : index
    %c192_127 = arith.constant 192 : index
    %97 = vector.load %arg7[%c24_126, %c192_127] : memref<36x512xbf16, #tpu.memory_space<vmem>>, vector<4x32xbf16>
    tpu.vector_store %arg7[%c24_126, %c192_127], %79 {strides = array<i32>} : memref<36x512xbf16, #tpu.memory_space<vmem>>, vector<4x32xbf16>,
    %c28_128 = arith.constant 28 : index
    %c192_129 = arith.constant 192 : index
    %98 = vector.load %arg7[%c28_128, %c192_129] : memref<36x512xbf16, #tpu.memory_space<vmem>>, vector<4x32xbf16>
    tpu.vector_store %arg7[%c28_128, %c192_129], %80 {strides = array<i32>} : memref<36x512xbf16, #tpu.memory_space<vmem>>, vector<4x32xbf16>,
    %c32_130 = arith.constant 32 : index
    %c192_131 = arith.constant 192 : index
    %99 = vector.load %arg7[%c32_130, %c192_131] : memref<36x512xbf16, #tpu.memory_space<vmem>>, vector<4x32xbf16>
    tpu.vector_store %arg7[%c32_130, %c192_131], %81 {strides = array<i32>} : memref<36x512xbf16, #tpu.memory_space<vmem>>, vector<4x32xbf16>,
    %100 = vector.extract_strided_slice %7 {offsets = [20, 0], sizes = [4, 34], strides = [1, 1]} : vector<40x34xbf16> to vector<4x34xbf16>
    %101 = vector.extract_strided_slice %100 {offsets = [0, 0], sizes = [4, 32], strides = [1, 1]} : vector<4x34xbf16> to vector<4x32xbf16>
    %102 = vector.extract_strided_slice %100 {offsets = [0, 1], sizes = [4, 32], strides = [1, 1]} : vector<4x34xbf16> to vector<4x32xbf16>
    %103 = vector.extract_strided_slice %100 {offsets = [0, 2], sizes = [4, 32], strides = [1, 1]} : vector<4x34xbf16> to vector<4x32xbf16>
    %c0_132 = arith.constant 0 : index
    %c288 = arith.constant 288 : index
    %104 = vector.load %arg7[%c0_132, %c288] : memref<36x512xbf16, #tpu.memory_space<vmem>>, vector<4x32xbf16>
    tpu.vector_store %arg7[%c0_132, %c288], %101 {strides = array<i32>} : memref<36x512xbf16, #tpu.memory_space<vmem>>, vector<4x32xbf16>,
    %c4_133 = arith.constant 4 : index
    %c288_134 = arith.constant 288 : index
    %105 = vector.load %arg7[%c4_133, %c288_134] : memref<36x512xbf16, #tpu.memory_space<vmem>>, vector<4x32xbf16>
    tpu.vector_store %arg7[%c4_133, %c288_134], %102 {strides = array<i32>} : memref<36x512xbf16, #tpu.memory_space<vmem>>, vector<4x32xbf16>,
    %c8_135 = arith.constant 8 : index
    %c288_136 = arith.constant 288 : index
    %106 = vector.load %arg7[%c8_135, %c288_136] : memref<36x512xbf16, #tpu.memory_space<vmem>>, vector<4x32xbf16>
    tpu.vector_store %arg7[%c8_135, %c288_136], %103 {strides = array<i32>} : memref<36x512xbf16, #tpu.memory_space<vmem>>, vector<4x32xbf16>,
    %c12_137 = arith.constant 12 : index
    %c256_138 = arith.constant 256 : index
    %107 = vector.load %arg7[%c12_137, %c256_138] : memref<36x512xbf16, #tpu.memory_space<vmem>>, vector<4x32xbf16>
    tpu.vector_store %arg7[%c12_137, %c256_138], %101 {strides = array<i32>} : memref<36x512xbf16, #tpu.memory_space<vmem>>, vector<4x32xbf16>,
    %c16_139 = arith.constant 16 : index
    %c256_140 = arith.constant 256 : index
    %108 = vector.load %arg7[%c16_139, %c256_140] : memref<36x512xbf16, #tpu.memory_space<vmem>>, vector<4x32xbf16>
    tpu.vector_store %arg7[%c16_139, %c256_140], %102 {strides = array<i32>} : memref<36x512xbf16, #tpu.memory_space<vmem>>, vector<4x32xbf16>,
    %c20_141 = arith.constant 20 : index
    %c256_142 = arith.constant 256 : index
    %109 = vector.load %arg7[%c20_141, %c256_142] : memref<36x512xbf16, #tpu.memory_space<vmem>>, vector<4x32xbf16>
    tpu.vector_store %arg7[%c20_141, %c256_142], %103 {strides = array<i32>} : memref<36x512xbf16, #tpu.memory_space<vmem>>, vector<4x32xbf16>,
    %c24_143 = arith.constant 24 : index
    %c224_144 = arith.constant 224 : index
    %110 = vector.load %arg7[%c24_143, %c224_144] : memref<36x512xbf16, #tpu.memory_space<vmem>>, vector<4x32xbf16>
    tpu.vector_store %arg7[%c24_143, %c224_144], %101 {strides = array<i32>} : memref<36x512xbf16, #tpu.memory_space<vmem>>, vector<4x32xbf16>,
    %c28_145 = arith.constant 28 : index
    %c224_146 = arith.constant 224 : index
    %111 = vector.load %arg7[%c28_145, %c224_146] : memref<36x512xbf16, #tpu.memory_space<vmem>>, vector<4x32xbf16>
    tpu.vector_store %arg7[%c28_145, %c224_146], %102 {strides = array<i32>} : memref<36x512xbf16, #tpu.memory_space<vmem>>, vector<4x32xbf16>,
    %c32_147 = arith.constant 32 : index
    %c224_148 = arith.constant 224 : index
    %112 = vector.load %arg7[%c32_147, %c224_148] : memref<36x512xbf16, #tpu.memory_space<vmem>>, vector<4x32xbf16>
    tpu.vector_store %arg7[%c32_147, %c224_148], %103 {strides = array<i32>} : memref<36x512xbf16, #tpu.memory_space<vmem>>, vector<4x32xbf16>,
    %c0_149 = arith.constant 0 : index
    %c320 = arith.constant 320 : index
    %113 = vector.load %arg7[%c0_149, %c320] : memref<36x512xbf16, #tpu.memory_space<vmem>>, vector<4x32xbf16>
    tpu.vector_store %arg7[%c0_149, %c320], %101 {strides = array<i32>} : memref<36x512xbf16, #tpu.memory_space<vmem>>, vector<4x32xbf16>,
    %c4_150 = arith.constant 4 : index
    %c320_151 = arith.constant 320 : index
    %114 = vector.load %arg7[%c4_150, %c320_151] : memref<36x512xbf16, #tpu.memory_space<vmem>>, vector<4x32xbf16>
    tpu.vector_store %arg7[%c4_150, %c320_151], %102 {strides = array<i32>} : memref<36x512xbf16, #tpu.memory_space<vmem>>, vector<4x32xbf16>,
    %c8_152 = arith.constant 8 : index
    %c320_153 = arith.constant 320 : index
    %115 = vector.load %arg7[%c8_152, %c320_153] : memref<36x512xbf16, #tpu.memory_space<vmem>>, vector<4x32xbf16>
    tpu.vector_store %arg7[%c8_152, %c320_153], %103 {strides = array<i32>} : memref<36x512xbf16, #tpu.memory_space<vmem>>, vector<4x32xbf16>,
    %c12_154 = arith.constant 12 : index
    %c288_155 = arith.constant 288 : index
    %116 = vector.load %arg7[%c12_154, %c288_155] : memref<36x512xbf16, #tpu.memory_space<vmem>>, vector<4x32xbf16>
    tpu.vector_store %arg7[%c12_154, %c288_155], %101 {strides = array<i32>} : memref<36x512xbf16, #tpu.memory_space<vmem>>, vector<4x32xbf16>,
    %c16_156 = arith.constant 16 : index
    %c288_157 = arith.constant 288 : index
    %117 = vector.load %arg7[%c16_156, %c288_157] : memref<36x512xbf16, #tpu.memory_space<vmem>>, vector<4x32xbf16>
    tpu.vector_store %arg7[%c16_156, %c288_157], %102 {strides = array<i32>} : memref<36x512xbf16, #tpu.memory_space<vmem>>, vector<4x32xbf16>,
    %c20_158 = arith.constant 20 : index
    %c288_159 = arith.constant 288 : index
    %118 = vector.load %arg7[%c20_158, %c288_159] : memref<36x512xbf16, #tpu.memory_space<vmem>>, vector<4x32xbf16>
    tpu.vector_store %arg7[%c20_158, %c288_159], %103 {strides = array<i32>} : memref<36x512xbf16, #tpu.memory_space<vmem>>, vector<4x32xbf16>,
    %c24_160 = arith.constant 24 : index
    %c256_161 = arith.constant 256 : index
    %119 = vector.load %arg7[%c24_160, %c256_161] : memref<36x512xbf16, #tpu.memory_space<vmem>>, vector<4x32xbf16>
    tpu.vector_store %arg7[%c24_160, %c256_161], %101 {strides = array<i32>} : memref<36x512xbf16, #tpu.memory_space<vmem>>, vector<4x32xbf16>,
    %c28_162 = arith.constant 28 : index
    %c256_163 = arith.constant 256 : index
    %120 = vector.load %arg7[%c28_162, %c256_163] : memref<36x512xbf16, #tpu.memory_space<vmem>>, vector<4x32xbf16>
    tpu.vector_store %arg7[%c28_162, %c256_163], %102 {strides = array<i32>} : memref<36x512xbf16, #tpu.memory_space<vmem>>, vector<4x32xbf16>,
    %c32_164 = arith.constant 32 : index
    %c256_165 = arith.constant 256 : index
    %121 = vector.load %arg7[%c32_164, %c256_165] : memref<36x512xbf16, #tpu.memory_space<vmem>>, vector<4x32xbf16>
    tpu.vector_store %arg7[%c32_164, %c256_165], %103 {strides = array<i32>} : memref<36x512xbf16, #tpu.memory_space<vmem>>, vector<4x32xbf16>,
    %122 = vector.extract_strided_slice %7 {offsets = [24, 0], sizes = [4, 34], strides = [1, 1]} : vector<40x34xbf16> to vector<4x34xbf16>
    %123 = vector.extract_strided_slice %122 {offsets = [0, 0], sizes = [4, 32], strides = [1, 1]} : vector<4x34xbf16> to vector<4x32xbf16>
    %124 = vector.extract_strided_slice %122 {offsets = [0, 1], sizes = [4, 32], strides = [1, 1]} : vector<4x34xbf16> to vector<4x32xbf16>
    %125 = vector.extract_strided_slice %122 {offsets = [0, 2], sizes = [4, 32], strides = [1, 1]} : vector<4x34xbf16> to vector<4x32xbf16>
    %c0_166 = arith.constant 0 : index
    %c352 = arith.constant 352 : index
    %126 = vector.load %arg7[%c0_166, %c352] : memref<36x512xbf16, #tpu.memory_space<vmem>>, vector<4x32xbf16>
    tpu.vector_store %arg7[%c0_166, %c352], %123 {strides = array<i32>} : memref<36x512xbf16, #tpu.memory_space<vmem>>, vector<4x32xbf16>,
    %c4_167 = arith.constant 4 : index
    %c352_168 = arith.constant 352 : index
    %127 = vector.load %arg7[%c4_167, %c352_168] : memref<36x512xbf16, #tpu.memory_space<vmem>>, vector<4x32xbf16>
    tpu.vector_store %arg7[%c4_167, %c352_168], %124 {strides = array<i32>} : memref<36x512xbf16, #tpu.memory_space<vmem>>, vector<4x32xbf16>,
    %c8_169 = arith.constant 8 : index
    %c352_170 = arith.constant 352 : index
    %128 = vector.load %arg7[%c8_169, %c352_170] : memref<36x512xbf16, #tpu.memory_space<vmem>>, vector<4x32xbf16>
    tpu.vector_store %arg7[%c8_169, %c352_170], %125 {strides = array<i32>} : memref<36x512xbf16, #tpu.memory_space<vmem>>, vector<4x32xbf16>,
    %c12_171 = arith.constant 12 : index
    %c320_172 = arith.constant 320 : index
    %129 = vector.load %arg7[%c12_171, %c320_172] : memref<36x512xbf16, #tpu.memory_space<vmem>>, vector<4x32xbf16>
    tpu.vector_store %arg7[%c12_171, %c320_172], %123 {strides = array<i32>} : memref<36x512xbf16, #tpu.memory_space<vmem>>, vector<4x32xbf16>,
    %c16_173 = arith.constant 16 : index
    %c320_174 = arith.constant 320 : index
    %130 = vector.load %arg7[%c16_173, %c320_174] : memref<36x512xbf16, #tpu.memory_space<vmem>>, vector<4x32xbf16>
    tpu.vector_store %arg7[%c16_173, %c320_174], %124 {strides = array<i32>} : memref<36x512xbf16, #tpu.memory_space<vmem>>, vector<4x32xbf16>,
    %c20_175 = arith.constant 20 : index
    %c320_176 = arith.constant 320 : index
    %131 = vector.load %arg7[%c20_175, %c320_176] : memref<36x512xbf16, #tpu.memory_space<vmem>>, vector<4x32xbf16>
    tpu.vector_store %arg7[%c20_175, %c320_176], %125 {strides = array<i32>} : memref<36x512xbf16, #tpu.memory_space<vmem>>, vector<4x32xbf16>,
    %c24_177 = arith.constant 24 : index
    %c288_178 = arith.constant 288 : index
    %132 = vector.load %arg7[%c24_177, %c288_178] : memref<36x512xbf16, #tpu.memory_space<vmem>>, vector<4x32xbf16>
    tpu.vector_store %arg7[%c24_177, %c288_178], %123 {strides = array<i32>} : memref<36x512xbf16, #tpu.memory_space<vmem>>, vector<4x32xbf16>,
    %c28_179 = arith.constant 28 : index
    %c288_180 = arith.constant 288 : index
    %133 = vector.load %arg7[%c28_179, %c288_180] : memref<36x512xbf16, #tpu.memory_space<vmem>>, vector<4x32xbf16>
    tpu.vector_store %arg7[%c28_179, %c288_180], %124 {strides = array<i32>} : memref<36x512xbf16, #tpu.memory_space<vmem>>, vector<4x32xbf16>,
    %c32_181 = arith.constant 32 : index
    %c288_182 = arith.constant 288 : index
    %134 = vector.load %arg7[%c32_181, %c288_182] : memref<36x512xbf16, #tpu.memory_space<vmem>>, vector<4x32xbf16>
    tpu.vector_store %arg7[%c32_181, %c288_182], %125 {strides = array<i32>} : memref<36x512xbf16, #tpu.memory_space<vmem>>, vector<4x32xbf16>,
    %c0_183 = arith.constant 0 : index
    %c384 = arith.constant 384 : index
    %135 = vector.load %arg7[%c0_183, %c384] : memref<36x512xbf16, #tpu.memory_space<vmem>>, vector<4x32xbf16>
    tpu.vector_store %arg7[%c0_183, %c384], %123 {strides = array<i32>} : memref<36x512xbf16, #tpu.memory_space<vmem>>, vector<4x32xbf16>,
    %c4_184 = arith.constant 4 : index
    %c384_185 = arith.constant 384 : index
    %136 = vector.load %arg7[%c4_184, %c384_185] : memref<36x512xbf16, #tpu.memory_space<vmem>>, vector<4x32xbf16>
    tpu.vector_store %arg7[%c4_184, %c384_185], %124 {strides = array<i32>} : memref<36x512xbf16, #tpu.memory_space<vmem>>, vector<4x32xbf16>,
    %c8_186 = arith.constant 8 : index
    %c384_187 = arith.constant 384 : index
    %137 = vector.load %arg7[%c8_186, %c384_187] : memref<36x512xbf16, #tpu.memory_space<vmem>>, vector<4x32xbf16>
    tpu.vector_store %arg7[%c8_186, %c384_187], %125 {strides = array<i32>} : memref<36x512xbf16, #tpu.memory_space<vmem>>, vector<4x32xbf16>,
    %c12_188 = arith.constant 12 : index
    %c352_189 = arith.constant 352 : index
    %138 = vector.load %arg7[%c12_188, %c352_189] : memref<36x512xbf16, #tpu.memory_space<vmem>>, vector<4x32xbf16>
    tpu.vector_store %arg7[%c12_188, %c352_189], %123 {strides = array<i32>} : memref<36x512xbf16, #tpu.memory_space<vmem>>, vector<4x32xbf16>,
    %c16_190 = arith.constant 16 : index
    %c352_191 = arith.constant 352 : index
    %139 = vector.load %arg7[%c16_190, %c352_191] : memref<36x512xbf16, #tpu.memory_space<vmem>>, vector<4x32xbf16>
    tpu.vector_store %arg7[%c16_190, %c352_191], %124 {strides = array<i32>} : memref<36x512xbf16, #tpu.memory_space<vmem>>, vector<4x32xbf16>,
    %c20_192 = arith.constant 20 : index
    %c352_193 = arith.constant 352 : index
    %140 = vector.load %arg7[%c20_192, %c352_193] : memref<36x512xbf16, #tpu.memory_space<vmem>>, vector<4x32xbf16>
    tpu.vector_store %arg7[%c20_192, %c352_193], %125 {strides = array<i32>} : memref<36x512xbf16, #tpu.memory_space<vmem>>, vector<4x32xbf16>,
    %c24_194 = arith.constant 24 : index
    %c320_195 = arith.constant 320 : index
    %141 = vector.load %arg7[%c24_194, %c320_195] : memref<36x512xbf16, #tpu.memory_space<vmem>>, vector<4x32xbf16>
    tpu.vector_store %arg7[%c24_194, %c320_195], %123 {strides = array<i32>} : memref<36x512xbf16, #tpu.memory_space<vmem>>, vector<4x32xbf16>,
    %c28_196 = arith.constant 28 : index
    %c320_197 = arith.constant 320 : index
    %142 = vector.load %arg7[%c28_196, %c320_197] : memref<36x512xbf16, #tpu.memory_space<vmem>>, vector<4x32xbf16>
    tpu.vector_store %arg7[%c28_196, %c320_197], %124 {strides = array<i32>} : memref<36x512xbf16, #tpu.memory_space<vmem>>, vector<4x32xbf16>,
    %c32_198 = arith.constant 32 : index
    %c320_199 = arith.constant 320 : index
    %143 = vector.load %arg7[%c32_198, %c320_199] : memref<36x512xbf16, #tpu.memory_space<vmem>>, vector<4x32xbf16>
    tpu.vector_store %arg7[%c32_198, %c320_199], %125 {strides = array<i32>} : memref<36x512xbf16, #tpu.memory_space<vmem>>, vector<4x32xbf16>,
    %144 = vector.extract_strided_slice %7 {offsets = [28, 0], sizes = [4, 34], strides = [1, 1]} : vector<40x34xbf16> to vector<4x34xbf16>
    %145 = vector.extract_strided_slice %144 {offsets = [0, 0], sizes = [4, 32], strides = [1, 1]} : vector<4x34xbf16> to vector<4x32xbf16>
    %146 = vector.extract_strided_slice %144 {offsets = [0, 1], sizes = [4, 32], strides = [1, 1]} : vector<4x34xbf16> to vector<4x32xbf16>
    %147 = vector.extract_strided_slice %144 {offsets = [0, 2], sizes = [4, 32], strides = [1, 1]} : vector<4x34xbf16> to vector<4x32xbf16>
    %c0_200 = arith.constant 0 : index
    %c416 = arith.constant 416 : index
    %148 = vector.load %arg7[%c0_200, %c416] : memref<36x512xbf16, #tpu.memory_space<vmem>>, vector<4x32xbf16>
    tpu.vector_store %arg7[%c0_200, %c416], %145 {strides = array<i32>} : memref<36x512xbf16, #tpu.memory_space<vmem>>, vector<4x32xbf16>,
    %c4_201 = arith.constant 4 : index
    %c416_202 = arith.constant 416 : index
    %149 = vector.load %arg7[%c4_201, %c416_202] : memref<36x512xbf16, #tpu.memory_space<vmem>>, vector<4x32xbf16>
    tpu.vector_store %arg7[%c4_201, %c416_202], %146 {strides = array<i32>} : memref<36x512xbf16, #tpu.memory_space<vmem>>, vector<4x32xbf16>,
    %c8_203 = arith.constant 8 : index
    %c416_204 = arith.constant 416 : index
    %150 = vector.load %arg7[%c8_203, %c416_204] : memref<36x512xbf16, #tpu.memory_space<vmem>>, vector<4x32xbf16>
    tpu.vector_store %arg7[%c8_203, %c416_204], %147 {strides = array<i32>} : memref<36x512xbf16, #tpu.memory_space<vmem>>, vector<4x32xbf16>,
    %c12_205 = arith.constant 12 : index
    %c384_206 = arith.constant 384 : index
    %151 = vector.load %arg7[%c12_205, %c384_206] : memref<36x512xbf16, #tpu.memory_space<vmem>>, vector<4x32xbf16>
    tpu.vector_store %arg7[%c12_205, %c384_206], %145 {strides = array<i32>} : memref<36x512xbf16, #tpu.memory_space<vmem>>, vector<4x32xbf16>,
    %c16_207 = arith.constant 16 : index
    %c384_208 = arith.constant 384 : index
    %152 = vector.load %arg7[%c16_207, %c384_208] : memref<36x512xbf16, #tpu.memory_space<vmem>>, vector<4x32xbf16>
    tpu.vector_store %arg7[%c16_207, %c384_208], %146 {strides = array<i32>} : memref<36x512xbf16, #tpu.memory_space<vmem>>, vector<4x32xbf16>,
    %c20_209 = arith.constant 20 : index
    %c384_210 = arith.constant 384 : index
    %153 = vector.load %arg7[%c20_209, %c384_210] : memref<36x512xbf16, #tpu.memory_space<vmem>>, vector<4x32xbf16>
    tpu.vector_store %arg7[%c20_209, %c384_210], %147 {strides = array<i32>} : memref<36x512xbf16, #tpu.memory_space<vmem>>, vector<4x32xbf16>,
    %c24_211 = arith.constant 24 : index
    %c352_212 = arith.constant 352 : index
    %154 = vector.load %arg7[%c24_211, %c352_212] : memref<36x512xbf16, #tpu.memory_space<vmem>>, vector<4x32xbf16>
    tpu.vector_store %arg7[%c24_211, %c352_212], %145 {strides = array<i32>} : memref<36x512xbf16, #tpu.memory_space<vmem>>, vector<4x32xbf16>,
    %c28_213 = arith.constant 28 : index
    %c352_214 = arith.constant 352 : index
    %155 = vector.load %arg7[%c28_213, %c352_214] : memref<36x512xbf16, #tpu.memory_space<vmem>>, vector<4x32xbf16>
    tpu.vector_store %arg7[%c28_213, %c352_214], %146 {strides = array<i32>} : memref<36x512xbf16, #tpu.memory_space<vmem>>, vector<4x32xbf16>,
    %c32_215 = arith.constant 32 : index
    %c352_216 = arith.constant 352 : index
    %156 = vector.load %arg7[%c32_215, %c352_216] : memref<36x512xbf16, #tpu.memory_space<vmem>>, vector<4x32xbf16>
    tpu.vector_store %arg7[%c32_215, %c352_216], %147 {strides = array<i32>} : memref<36x512xbf16, #tpu.memory_space<vmem>>, vector<4x32xbf16>,
    %c0_217 = arith.constant 0 : index
    %c448 = arith.constant 448 : index
    %157 = vector.load %arg7[%c0_217, %c448] : memref<36x512xbf16, #tpu.memory_space<vmem>>, vector<4x32xbf16>
    tpu.vector_store %arg7[%c0_217, %c448], %145 {strides = array<i32>} : memref<36x512xbf16, #tpu.memory_space<vmem>>, vector<4x32xbf16>,
    %c4_218 = arith.constant 4 : index
    %c448_219 = arith.constant 448 : index
    %158 = vector.load %arg7[%c4_218, %c448_219] : memref<36x512xbf16, #tpu.memory_space<vmem>>, vector<4x32xbf16>
    tpu.vector_store %arg7[%c4_218, %c448_219], %146 {strides = array<i32>} : memref<36x512xbf16, #tpu.memory_space<vmem>>, vector<4x32xbf16>,
    %c8_220 = arith.constant 8 : index
    %c448_221 = arith.constant 448 : index
    %159 = vector.load %arg7[%c8_220, %c448_221] : memref<36x512xbf16, #tpu.memory_space<vmem>>, vector<4x32xbf16>
    tpu.vector_store %arg7[%c8_220, %c448_221], %147 {strides = array<i32>} : memref<36x512xbf16, #tpu.memory_space<vmem>>, vector<4x32xbf16>,
    %c12_222 = arith.constant 12 : index
    %c416_223 = arith.constant 416 : index
    %160 = vector.load %arg7[%c12_222, %c416_223] : memref<36x512xbf16, #tpu.memory_space<vmem>>, vector<4x32xbf16>
    tpu.vector_store %arg7[%c12_222, %c416_223], %145 {strides = array<i32>} : memref<36x512xbf16, #tpu.memory_space<vmem>>, vector<4x32xbf16>,
    %c16_224 = arith.constant 16 : index
    %c416_225 = arith.constant 416 : index
    %161 = vector.load %arg7[%c16_224, %c416_225] : memref<36x512xbf16, #tpu.memory_space<vmem>>, vector<4x32xbf16>
    tpu.vector_store %arg7[%c16_224, %c416_225], %146 {strides = array<i32>} : memref<36x512xbf16, #tpu.memory_space<vmem>>, vector<4x32xbf16>,
    %c20_226 = arith.constant 20 : index
    %c416_227 = arith.constant 416 : index
    %162 = vector.load %arg7[%c20_226, %c416_227] : memref<36x512xbf16, #tpu.memory_space<vmem>>, vector<4x32xbf16>
    tpu.vector_store %arg7[%c20_226, %c416_227], %147 {strides = array<i32>} : memref<36x512xbf16, #tpu.memory_space<vmem>>, vector<4x32xbf16>,
    %c24_228 = arith.constant 24 : index
    %c384_229 = arith.constant 384 : index
    %163 = vector.load %arg7[%c24_228, %c384_229] : memref<36x512xbf16, #tpu.memory_space<vmem>>, vector<4x32xbf16>
    tpu.vector_store %arg7[%c24_228, %c384_229], %145 {strides = array<i32>} : memref<36x512xbf16, #tpu.memory_space<vmem>>, vector<4x32xbf16>,
    %c28_230 = arith.constant 28 : index
    %c384_231 = arith.constant 384 : index
    %164 = vector.load %arg7[%c28_230, %c384_231] : memref<36x512xbf16, #tpu.memory_space<vmem>>, vector<4x32xbf16>
    tpu.vector_store %arg7[%c28_230, %c384_231], %146 {strides = array<i32>} : memref<36x512xbf16, #tpu.memory_space<vmem>>, vector<4x32xbf16>,
    %c32_232 = arith.constant 32 : index
    %c384_233 = arith.constant 384 : index
    %165 = vector.load %arg7[%c32_232, %c384_233] : memref<36x512xbf16, #tpu.memory_space<vmem>>, vector<4x32xbf16>
    tpu.vector_store %arg7[%c32_232, %c384_233], %147 {strides = array<i32>} : memref<36x512xbf16, #tpu.memory_space<vmem>>, vector<4x32xbf16>,
    %166 = vector.extract_strided_slice %7 {offsets = [32, 0], sizes = [4, 34], strides = [1, 1]} : vector<40x34xbf16> to vector<4x34xbf16>
    %167 = vector.extract_strided_slice %166 {offsets = [0, 0], sizes = [4, 32], strides = [1, 1]} : vector<4x34xbf16> to vector<4x32xbf16>
    %168 = vector.extract_strided_slice %166 {offsets = [0, 1], sizes = [4, 32], strides = [1, 1]} : vector<4x34xbf16> to vector<4x32xbf16>
    %169 = vector.extract_strided_slice %166 {offsets = [0, 2], sizes = [4, 32], strides = [1, 1]} : vector<4x34xbf16> to vector<4x32xbf16>
    %c0_234 = arith.constant 0 : index
    %c480 = arith.constant 480 : index
    %170 = vector.load %arg7[%c0_234, %c480] : memref<36x512xbf16, #tpu.memory_space<vmem>>, vector<4x32xbf16>
    tpu.vector_store %arg7[%c0_234, %c480], %167 {strides = array<i32>} : memref<36x512xbf16, #tpu.memory_space<vmem>>, vector<4x32xbf16>,
    %c4_235 = arith.constant 4 : index
    %c480_236 = arith.constant 480 : index
    %171 = vector.load %arg7[%c4_235, %c480_236] : memref<36x512xbf16, #tpu.memory_space<vmem>>, vector<4x32xbf16>
    tpu.vector_store %arg7[%c4_235, %c480_236], %168 {strides = array<i32>} : memref<36x512xbf16, #tpu.memory_space<vmem>>, vector<4x32xbf16>,
    %c8_237 = arith.constant 8 : index
    %c480_238 = arith.constant 480 : index
    %172 = vector.load %arg7[%c8_237, %c480_238] : memref<36x512xbf16, #tpu.memory_space<vmem>>, vector<4x32xbf16>
    tpu.vector_store %arg7[%c8_237, %c480_238], %169 {strides = array<i32>} : memref<36x512xbf16, #tpu.memory_space<vmem>>, vector<4x32xbf16>,
    %c12_239 = arith.constant 12 : index
    %c448_240 = arith.constant 448 : index
    %173 = vector.load %arg7[%c12_239, %c448_240] : memref<36x512xbf16, #tpu.memory_space<vmem>>, vector<4x32xbf16>
    tpu.vector_store %arg7[%c12_239, %c448_240], %167 {strides = array<i32>} : memref<36x512xbf16, #tpu.memory_space<vmem>>, vector<4x32xbf16>,
    %c16_241 = arith.constant 16 : index
    %c448_242 = arith.constant 448 : index
    %174 = vector.load %arg7[%c16_241, %c448_242] : memref<36x512xbf16, #tpu.memory_space<vmem>>, vector<4x32xbf16>
    tpu.vector_store %arg7[%c16_241, %c448_242], %168 {strides = array<i32>} : memref<36x512xbf16, #tpu.memory_space<vmem>>, vector<4x32xbf16>,
    %c20_243 = arith.constant 20 : index
    %c448_244 = arith.constant 448 : index
    %175 = vector.load %arg7[%c20_243, %c448_244] : memref<36x512xbf16, #tpu.memory_space<vmem>>, vector<4x32xbf16>
    tpu.vector_store %arg7[%c20_243, %c448_244], %169 {strides = array<i32>} : memref<36x512xbf16, #tpu.memory_space<vmem>>, vector<4x32xbf16>,
    %c24_245 = arith.constant 24 : index
    %c416_246 = arith.constant 416 : index
    %176 = vector.load %arg7[%c24_245, %c416_246] : memref<36x512xbf16, #tpu.memory_space<vmem>>, vector<4x32xbf16>
    tpu.vector_store %arg7[%c24_245, %c416_246], %167 {strides = array<i32>} : memref<36x512xbf16, #tpu.memory_space<vmem>>, vector<4x32xbf16>,
    %c28_247 = arith.constant 28 : index
    %c416_248 = arith.constant 416 : index
    %177 = vector.load %arg7[%c28_247, %c416_248] : memref<36x512xbf16, #tpu.memory_space<vmem>>, vector<4x32xbf16>
    tpu.vector_store %arg7[%c28_247, %c416_248], %168 {strides = array<i32>} : memref<36x512xbf16, #tpu.memory_space<vmem>>, vector<4x32xbf16>,
    %c32_249 = arith.constant 32 : index
    %c416_250 = arith.constant 416 : index
    %178 = vector.load %arg7[%c32_249, %c416_250] : memref<36x512xbf16, #tpu.memory_space<vmem>>, vector<4x32xbf16>
    tpu.vector_store %arg7[%c32_249, %c416_250], %169 {strides = array<i32>} : memref<36x512xbf16, #tpu.memory_space<vmem>>, vector<4x32xbf16>,
    %c12_251 = arith.constant 12 : index
    %c480_252 = arith.constant 480 : index
    %179 = vector.load %arg7[%c12_251, %c480_252] : memref<36x512xbf16, #tpu.memory_space<vmem>>, vector<4x32xbf16>
    tpu.vector_store %arg7[%c12_251, %c480_252], %167 {strides = array<i32>} : memref<36x512xbf16, #tpu.memory_space<vmem>>, vector<4x32xbf16>,
    %c16_253 = arith.constant 16 : index
    %c480_254 = arith.constant 480 : index
    %180 = vector.load %arg7[%c16_253, %c480_254] : memref<36x512xbf16, #tpu.memory_space<vmem>>, vector<4x32xbf16>
    tpu.vector_store %arg7[%c16_253, %c480_254], %168 {strides = array<i32>} : memref<36x512xbf16, #tpu.memory_space<vmem>>, vector<4x32xbf16>,
    %c20_255 = arith.constant 20 : index
    %c480_256 = arith.constant 480 : index
    %181 = vector.load %arg7[%c20_255, %c480_256] : memref<36x512xbf16, #tpu.memory_space<vmem>>, vector<4x32xbf16>
    tpu.vector_store %arg7[%c20_255, %c480_256], %169 {strides = array<i32>} : memref<36x512xbf16, #tpu.memory_space<vmem>>, vector<4x32xbf16>,
    %c24_257 = arith.constant 24 : index
    %c448_258 = arith.constant 448 : index
    %182 = vector.load %arg7[%c24_257, %c448_258] : memref<36x512xbf16, #tpu.memory_space<vmem>>, vector<4x32xbf16>
    tpu.vector_store %arg7[%c24_257, %c448_258], %167 {strides = array<i32>} : memref<36x512xbf16, #tpu.memory_space<vmem>>, vector<4x32xbf16>,
    %c28_259 = arith.constant 28 : index
    %c448_260 = arith.constant 448 : index
    %183 = vector.load %arg7[%c28_259, %c448_260] : memref<36x512xbf16, #tpu.memory_space<vmem>>, vector<4x32xbf16>
    tpu.vector_store %arg7[%c28_259, %c448_260], %168 {strides = array<i32>} : memref<36x512xbf16, #tpu.memory_space<vmem>>, vector<4x32xbf16>,
    %c32_261 = arith.constant 32 : index
    %c448_262 = arith.constant 448 : index
    %184 = vector.load %arg7[%c32_261, %c448_262] : memref<36x512xbf16, #tpu.memory_space<vmem>>, vector<4x32xbf16>
    tpu.vector_store %arg7[%c32_261, %c448_262], %169 {strides = array<i32>} : memref<36x512xbf16, #tpu.memory_space<vmem>>, vector<4x32xbf16>,
    %185 = vector.extract_strided_slice %7 {offsets = [36, 0], sizes = [4, 34], strides = [1, 1]} : vector<40x34xbf16> to vector<4x34xbf16>
    %186 = vector.extract_strided_slice %185 {offsets = [0, 0], sizes = [4, 32], strides = [1, 1]} : vector<4x34xbf16> to vector<4x32xbf16>
    %187 = vector.extract_strided_slice %185 {offsets = [0, 1], sizes = [4, 32], strides = [1, 1]} : vector<4x34xbf16> to vector<4x32xbf16>
    %188 = vector.extract_strided_slice %185 {offsets = [0, 2], sizes = [4, 32], strides = [1, 1]} : vector<4x34xbf16> to vector<4x32xbf16>
    %c24_263 = arith.constant 24 : index
    %c480_264 = arith.constant 480 : index
    %189 = vector.load %arg7[%c24_263, %c480_264] : memref<36x512xbf16, #tpu.memory_space<vmem>>, vector<4x32xbf16>
    tpu.vector_store %arg7[%c24_263, %c480_264], %186 {strides = array<i32>} : memref<36x512xbf16, #tpu.memory_space<vmem>>, vector<4x32xbf16>,
    %c28_265 = arith.constant 28 : index
    %c480_266 = arith.constant 480 : index
    %190 = vector.load %arg7[%c28_265, %c480_266] : memref<36x512xbf16, #tpu.memory_space<vmem>>, vector<4x32xbf16>
    tpu.vector_store %arg7[%c28_265, %c480_266], %187 {strides = array<i32>} : memref<36x512xbf16, #tpu.memory_space<vmem>>, vector<4x32xbf16>,
    %c32_267 = arith.constant 32 : index
    %c480_268 = arith.constant 480 : index
    %191 = vector.load %arg7[%c32_267, %c480_268] : memref<36x512xbf16, #tpu.memory_space<vmem>>, vector<4x32xbf16>
    tpu.vector_store %arg7[%c32_267, %c480_268], %188 {strides = array<i32>} : memref<36x512xbf16, #tpu.memory_space<vmem>>, vector<4x32xbf16>,
    %c0_269 = arith.constant 0 : index
    %c0_270 = arith.constant 0 : index
    %192 = vector.load %arg3[%c0_269, %c0_270] : memref<8x36xbf16, #tpu.memory_space<vmem>>, vector<8x36xbf16>
    %c0_271 = arith.constant 0 : index
    %c0_272 = arith.constant 0 : index
    %193 = vector.load %arg7[%c0_271, %c0_272] : memref<36x512xbf16, #tpu.memory_space<vmem>>, vector<36x512xbf16>
    %cst_273 = arith.constant dense<0.000000e+00> : vector<8x512xf32>
    %194 = tpu.matmul %192, %193, %cst_273 {dimension_numbers = #tpu.dot_dimension_numbers<[1], [0], [0], [1], [0, 0, 1, 1], [], []>} : vector<8x36xbf16>, vector<36x512xbf16>, vector<8x512xf32> -> vector<8x512xf32>
    %195 = arith.truncf %194 : vector<8x512xf32> to vector<8x512xbf16>
    %c0_274 = arith.constant 0 : index
    %c0_275 = arith.constant 0 : index
    %c0_276 = arith.constant 0 : index
    %196 = vector.load %arg5[%c0_274, %c0_275, %c0_276] : memref<1x8x512xbf16, #tpu.memory_space<vmem>>, vector<1x8x512xbf16>
    %197 = vector.shape_cast %196 : vector<1x8x512xbf16> to vector<8x512xbf16>
    %198 = vector.shape_cast %195 : vector<8x512xbf16> to vector<1x8x512xbf16>
    tpu.vector_store %arg5[%c0_274, %c0_275, %c0_276], %198 {strides = array<i32>} : memref<1x8x512xbf16, #tpu.memory_space<vmem>>, vector<1x8x512xbf16>,
    %cst_277 = arith.constant dense<0.000000e+00> : vector<8xf32>
    %199 = vector.multi_reduction <add>, %194, %cst_277 [1] : vector<8x512xf32> to vector<8xf32>
    %200 = vector.shape_cast %199 : vector<8xf32> to vector<8x1xf32>
    %cst_278 = arith.constant 0.001953125 : f32
    %201 = vector.broadcast %cst_278 : f32 to vector<8x1xf32>
    %202 = arith.mulf %200, %201 : vector<8x1xf32>
    %203 = vector.broadcast %202 : vector<8x1xf32> to vector<8x512xf32>
    %204 = arith.subf %194, %203 : vector<8x512xf32>
    %205 = arith.mulf %204, %204 : vector<8x512xf32>
    %cst_279 = arith.constant dense<0.000000e+00> : vector<8xf32>
    %206 = vector.multi_reduction <add>, %205, %cst_279 [1] : vector<8x512xf32> to vector<8xf32>
    %207 = vector.shape_cast %206 : vector<8xf32> to vector<8x1xf32>
    %c0_280 = arith.constant 0 : index
    %c0_281 = arith.constant 0 : index
    %c0_282 = arith.constant 0 : index
    %c0_283 = arith.constant 0 : index
    %208 = vector.load %arg6[%c0_280, %c0_281, %c0_282, %c0_283] : memref<1x1x8x2xf32, #tpu.memory_space<vmem>>, vector<1x1x8x1xf32>
    %209 = vector.shape_cast %208 : vector<1x1x8x1xf32> to vector<8x1xf32>
    %210 = vector.shape_cast %200 : vector<8x1xf32> to vector<1x1x8x1xf32>
    tpu.vector_store %arg6[%c0_280, %c0_281, %c0_282, %c0_283], %210 {strides = array<i32>} : memref<1x1x8x2xf32, #tpu.memory_space<vmem>>, vector<1x1x8x1xf32>,
    %c0_284 = arith.constant 0 : index
    %c0_285 = arith.constant 0 : index
    %c0_286 = arith.constant 0 : index
    %c1 = arith.constant 1 : index
    %211 = vector.load %arg6[%c0_284, %c0_285, %c0_286, %c1] : memref<1x1x8x2xf32, #tpu.memory_space<vmem>>, vector<1x1x8x1xf32>
    %212 = vector.shape_cast %211 : vector<1x1x8x1xf32> to vector<8x1xf32>
    %213 = vector.shape_cast %207 : vector<8x1xf32> to vector<1x1x8x1xf32>
    tpu.vector_store %arg6[%c0_284, %c0_285, %c0_286, %c1], %213 {strides = array<i32>} : memref<1x1x8x2xf32, #tpu.memory_space<vmem>>, vector<1x1x8x1xf32>,
    return
  }
  func.func @transform_0(%arg0: i32, %arg1: i32) -> (i32, i32, i32) {
    %c0_i32 = arith.constant 0 : i32
    %c0_i32_0 = arith.constant 0 : i32
    %c0_i32_1 = arith.constant 0 : i32
    return %arg0, %c0_i32, %c0_i32_0 : i32, i32, i32
  }
  func.func @transform_1(%arg0: i32, %arg1: i32) -> (i32, i32) {
    %c0_i32 = arith.constant 0 : i32
    %c0_i32_0 = arith.constant 0 : i32
    %c0_i32_1 = arith.constant 0 : i32
    return %c0_i32, %c0_i32_0 : i32, i32
  }
  func.func @transform_2(%arg0: i32, %arg1: i32) -> (i32, i32) {
    %c0_i32 = arith.constant 0 : i32
    %c0_i32_0 = arith.constant 0 : i32
    %c0_i32_1 = arith.constant 0 : i32
    return %c0_i32, %c0_i32_0 : i32, i32
  }
  func.func @transform_3(%arg0: i32, %arg1: i32) -> (i32, i32, i32) {
    %c0_i32 = arith.constant 0 : i32
    %c0_i32_0 = arith.constant 0 : i32
    return %arg0, %c0_i32, %arg1 : i32, i32, i32
  }
  func.func @transform_4(%arg0: i32, %arg1: i32) -> (i32, i32, i32, i32) {
    %c0_i32 = arith.constant 0 : i32
    %c0_i32_0 = arith.constant 0 : i32
    %c0_i32_1 = arith.constant 0 : i32
    return %arg0, %arg1, %c0_i32, %c0_i32_0 : i32, i32, i32, i32
  }
}

</mosaic_0001>

<bundles_post_ra>
// kernel: up_block2d.3
= control target key start
LH: loop header
LB: loop body
LE: loop exit
PB: predicated region body
PF: predicated region fallthrough
CT: control target
= control target key end

     0   :  { %s437_s12 = smov 0   ;;  %s439_s13 = smov 0   ;;  %s480_s0 = inlined_call_operand.vmem [shape: bf16[2,8,1024], index: 0, kind: input, shape index: {}]   ;;  %s481_s1 = inlined_call_operand.vmem [shape: f32[8,1], index: 1, kind: input, shape index: {}]   ;;  %s482_s2 = inlined_call_operand.vmem [shape: f32[8,1], index: 2, kind: input, shape index: {}]   ;;  %s483_s3 = inlined_call_operand.vmem [shape: f32[2,8,1024], index: 3, kind: output, shape index: {}]  }
   0x1   :  { %s441_s14 = smov 0  }
   0x2 LB: > { %s25_s15 = sadd.s32 1, %s410_s13  ;;  %p357_p0 = scmp.ge.s32.totalorder %s414_s14, 1  ;;  %s414_s14 = sphi %s441_s14, %s13_s14   ;;  %s410_s13 = sphi %s439_s13, %s485_s13   ;;  %s406_s12 = sphi %s437_s12, %s484_s12  }
   0x3   : > { %p27_p1 = scmp.ge.s32.totalorder %s25_s15, 2  ;;  %p158_p2 = scmp.lt.s32.totalorder %s414_s14, 3 }
   0x5   : > { %s487_s15 = smov (%p27_p1, %s25_s15), 0  ;;  %p159_p3 = pnand %p357_p0, %p158_p2 }
   0x6   : > { %p191_p4 = scmp.lt.s32.totalorder (!%p159_p3), %s406_s12, 1 }
   0x7   : > { %162 = sbr.rel (%p159_p3) target bundleno = 149 (0x95), region = 32 }
   0xc   : > { %v222_v0 = vld [vmem:[%s481_s1] sm:$0xff]  ;;  %v416_v1 = vmov 0   ;;  %s489_s12 = smov (!%p191_p4, %s406_s12), 1 }
   0xd   : > { %391 = vset.pattern.permute.xlu0 %v416_v1  ;;  %v236_v2 = vld [vmem:[%s482_s2] sm:$0xff]  ;;  %s364_s20 = sshll.u32 %s489_s12, 5  ;;  %s365_s24 = sshll.u32 %s489_s12, 6 }
   0xe   : > { %225 = vperm.xlu0 %391, %v222_v0   ;;  %s198_s23 = scalar_lea.vmem %s480_s0, %s364_s20  ;;  %s208_s27 = scalar_lea.vmem %s483_s3, %s365_s24 }
   0xf   : > { %v210_v4 = vld [vmem:[%s198_s23] sm:$0xff]  ;;  %v211_v5 = vld [vmem:[%s198_s23 + $0x8] sm:$0xff]  ;;  %v212_v6 = vld [vmem:[%s198_s23 + $0x10] sm:$0xff] }
  0x10   : > { %v213_v7 = vld [vmem:[%s198_s23 + $0x18] sm:$0xff]  ;;  %v214_v8 = vunpack.c.l.bf16 %v210_v4  ;;  %v215_v9 = vunpack.c.h.bf16 %v210_v4  ;;  %v216_v10 = vunpack.c.l.bf16 %v211_v5  ;;  %v217_v11 = vunpack.c.h.bf16 %v211_v5 }
  0x11   : > { %v218_v12 = vunpack.c.l.bf16 %v212_v6  ;;  %v219_v13 = vunpack.c.h.bf16 %v212_v6  ;;  %v220_v14 = vunpack.c.l.bf16 %v213_v7  ;;  %v221_v15 = vunpack.c.h.bf16 %v213_v7 }
  0x16   : > { %239 = vperm.xlu0 %391, %v236_v2  }
  0x80   : > { %v226_v3 = vpop.permute.xlu0 %225 }
  0x81   : > { %v228_v16 = vmul.f32 %v226_v3, %v214_v8  ;;  %v229_v17 = vmul.f32 %v226_v3, %v215_v9  ;;  %v230_v18 = vmul.f32 %v226_v3, %v216_v10  ;;  %v231_v19 = vmul.f32 %v226_v3, %v217_v11 }
  0x82   : > { %v232_v21 = vmul.f32 %v226_v3, %v218_v12  ;;  %v233_v22 = vmul.f32 %v226_v3, %v219_v13  ;;  %v234_v23 = vmul.f32 %v226_v3, %v220_v14  ;;  %v235_v28 = vmul.f32 %v226_v3, %v221_v15 }
  0x88   : > { %v240_v20 = vpop.permute.xlu0 %239 }
  0x89   : > { %v242_v24 = vadd.f32 %v240_v20, %v228_v16  ;;  %v243_v25 = vadd.f32 %v240_v20, %v229_v17  ;;  %v244_v26 = vadd.f32 %v240_v20, %v230_v18  ;;  %v245_v27 = vadd.f32 %v240_v20, %v231_v19 }
  0x8a   : > { %v246_v29 = vadd.f32 %v240_v20, %v232_v21  ;;  %v247_v30 = vadd.f32 %v240_v20, %v233_v22  ;;  %v248_v31 = vadd.f32 %v240_v20, %v234_v23  ;;  %v249_v35 = vadd.f32 %v240_v20, %v235_v28 }
  0x8b   : > { %v250_v32 = vmax.f32 %v242_v24, 0.0  ;;  %v251_v33 = vmax.f32 %v243_v25, 0.0  ;;  %v252_v34 = vmax.f32 %v244_v26, 0.0  ;;  %v253_v36 = vmax.f32 %v245_v27, 0.0 }
  0x8c   : > { %v254_v37 = vmax.f32 %v246_v29, 0.0  ;;  %v255_v38 = vmax.f32 %v247_v30, 0.0  ;;  %v256_v39 = vmax.f32 %v248_v31, 0.0  ;;  %v257_v40 = vmax.f32 %v249_v35, 0.0 }
  0x8d   : > { %258 = vst [vmem:[%s208_s27] sm:$0xff] %v250_v32 }
  0x8e   : > { %259 = vst [vmem:[%s208_s27 + $0x8] sm:$0xff] %v251_v33 }
  0x8f   : > { %260 = vst [vmem:[%s208_s27 + $0x10] sm:$0xff] %v252_v34 }
  0x90   : > { %261 = vst [vmem:[%s208_s27 + $0x18] sm:$0xff] %v253_v36 }
  0x91   : > { %262 = vst [vmem:[%s208_s27 + $0x20] sm:$0xff] %v254_v37 }
  0x92   : > { %263 = vst [vmem:[%s208_s27 + $0x28] sm:$0xff] %v255_v38 }
  0x93   : > { %264 = vst [vmem:[%s208_s27 + $0x30] sm:$0xff] %v256_v39 }
  0x94   : > { %265 = vst [vmem:[%s208_s27 + $0x38] sm:$0xff] %v257_v40 }
  0x95 PF: > { %s13_s14 = sadd.s32 1, %s414_s14   ;;  %s484_s12 = smov %s410_s13 }
  0x96   : > { %p10_p5 = scmp.ge.s32.totalorder %s13_s14, 4   ;;  %s485_s13 = smov %s487_s15 }
  0x98   :  { %12 = sbr.rel (!%p10_p5) target bundleno = 2 (0x2), region = 62 }

// kernel: up_block2d.2
= control target key start
LH: loop header
LB: loop body
LE: loop exit
PB: predicated region body
PF: predicated region fallthrough
CT: control target
= control target key end

     0   :  { %s1324_s15 = smov 0   ;;  %s1326_s16 = smov 0   ;;  %s1833_s0 = inlined_call_operand.vmem [shape: bf16[2,72,16], index: 0, kind: input, shape index: {}]   ;;  %s1834_s1 = inlined_call_operand.vmem [shape: bf16[8,36], index: 1, kind: input, shape index: {}]   ;;  %s1835_s2 = inlined_call_operand.vmem [shape: bf16[16,34], index: 2, kind: input, shape index: {}]   ;;  %s1836_s3 = inlined_call_operand.vmem [shape: bf16[2,8,1024], index: 3, kind: output, shape index: {0}]   ;;  %s1837_s4 = inlined_call_operand.vmem [shape: f32[2,2,8,2], index: 4, kind: output, shape index: {1}]  }
   0x1   :  { %s1328_s17 = smov 0   ;;  %s1330_s18 = smov 0  }
   0x2   :  { %s1332_s19 = smov 0  }
   0x3 LB: > { %s24_s20 = sadd.s32 1, %s1278_s17  ;;  %s27_s21 = sadd.s32 1, %s1282_s18  ;;  %s1286_s19 = sphi %s1332_s19, %s15_s19   ;;  %s1282_s18 = sphi %s1330_s18, %s1841_s18   ;;  %s1278_s17 = sphi %s1328_s17, %s1840_s17   ;;  %s1274_s16 = sphi %s1326_s16, %s1839_s16   ;;  %s1270_s15 = sphi %s1324_s15, %s1838_s15  }
   0x4   : > { %p25_p0 = scmp.ge.s32.totalorder %s24_s20, 2  ;;  %p1122_p1 = scmp.ge.s32.totalorder %s1286_s19, 1 }
   0x5   : > { %p181_p2 = scmp.lt.s32.totalorder %s1286_s19, 5 }
   0x6   : > { %s1843_s20 = smov (%p25_p0, %s24_s20), 0  ;;  %s1845_s21 = smov (!%p25_p0, %s27_s21), %s1282_s18 }
   0x7   : > { %p182_p3 = pnand %p1122_p1, %p181_p2  ;;  %p29_p4 = scmp.ge.s32.totalorder %s1845_s21, 2 }
   0x8   : > { %p219_p5 = scmp.lt.s32.totalorder (!%p182_p3), %s1274_s16, 1  ;;  %s1129_s24 = sshll.u32 (!%p182_p3), %s1270_s15, 5 }
   0x9   : > { %s1847_s21 = smov (%p29_p4, %s1845_s21), 0  ;;  %185 = sbr.rel (%p182_p3) target bundleno = 954 (0x3ba), region = 32 }
   0xa   : > { %s244_s25 = sshra.s32 (!%p182_p3), %s1129_s24, 3  ;;  %s1288_s6 = smov (!%p182_p3), 30  }
   0xb   : > { %s1130_s27 = sshll.u32 (!%p182_p3), %s244_s25, 2  ;;  %s1289_s7 = smov (!%p182_p3), 31  }
   0xc   : > { %s1290_s8 = smov (!%p182_p3), 126   ;;  %s1291_s9 = smov (!%p182_p3), 63  }
   0xd   : > { %s1292_s10 = smov (!%p182_p3), 32   ;;  %s1293_s11 = smov (!%p182_p3), 127  }
   0xe   : > { %v1186_v0 = vld [vmem:[%s1835_s2] sm:$0xff]  ;;  %s1849_s16 = smov (!%p219_p5, %s1274_s16), 1  ;;  %vm274_vm0 = vcmask 130048   ;;  %vm312_vm1 = vcmask 254976   ;;  %vm319_vm2 = vcmask 257026   ;;  %s1294_s12 = smov 62  }
   0xf   : > { %291 = vmatpush.bf16.msra.mxu0 %v1186_v0  ;;  %1195 = vmatpush.bf16.msra.mxu2 %v1186_v0  ;;  %s1196_s26 = smul.u32 36, %s1849_s16  ;;  %s1295_s13 = smov 96   ;;  %vm329_vm3 = vcmask 517376   ;;  %vm349_vm4 = vcmask 779776   ;;  %vm334_vm5 = vcmask 519426   ;;  %vm354_vm6 = vcmask 781826  }
  0x10   : > { %s1296_s14 = smov 64   ;;  %s1297_s22 = smov 94   ;;  %vm386_vm7 = vcmask 1042176   ;;  %vm392_vm8 = vcmask 1044226   ;;  %vm893_vm9 = vcmask 1041408   ;;  %vm889_vm10 = vcmask 293888  }
  0x11   : > { %s223_s30 = scalar_lea.vmem %s1833_s0, %s1196_s26  ;;  %s1298_s23 = smov 95   ;;  %vm981_vm11 = vcmask 7168   ;;  %vm983_vm12 = vcmask 15368  }
  0x12   : > { %s247_s5 = scalar_lea.vmem %s223_s30, %s1130_s27  ;;  %s1124_s26 = sshll.u32 %s1270_s15, 2 }
  0x13   : > { %v1184_v1 = vld [vmem:[%s247_s5] sm:$0xff]  ;;  %v252_v2 = vld [vmem:[%s247_s5 + $0x10] sm:$0xf]  ;;  %v1185_v5 = vld [vmem:[%s247_s5 + $0x8] sm:$0xff]  ;;  %p227_p6 = scmp.lt.s32.totalorder %s1124_s26, 7  ;;  %s1125_s27 = sshll.u32 %s1849_s16, 3 }
  0x14   : > { %v264_v3 = vunpack.c.l.b16 %v252_v2  ;;  %1143 = vmatmul.msk.bf16.vlgmr.msra.gmra.mxu0 %vm274_vm0, %v1184_v1  ;;  %p236_p7 = scmp.lt.s32.totalorder %s1270_s15, 1 }
  0x15   : > { %s1851_s26 = smov (!%p227_p6, %s1124_s26), 7 }
  0x16   : > { %v267_v4 = vpack.c.b16 %v264_v3, %v264_v3  ;;  %s230_s28 = sadd.s32 %s1125_s27, %s1851_s26  ;;  %s1853_s15 = smov (!%p236_p7, %s1270_s15), 1 }
  0x17   : > { %s1126_s29 = sshll.u32 %s230_s28, 2 }
  0x18   : > { %1145 = vmatmul.msk.bf16.vlgmr.msra.gmra.mxu2 %vm274_vm0, %v267_v4 }
  0x24   : > { %1144 = vmatmul.msk.bf16.gmra.mxu0 %vm274_vm0, %v1185_v5 }
  0x91   : > { %v293_v6 = vpop.f32.mrf.mxu0 }
  0x92   : > { %v307_v7 = vpack.c.bf16 %v293_v6, %v293_v6 }
  0x94   : > { %368 = vrot.lane.b32.xlu2 %v307_v7, %s1288_s6  ;;  %331 = vrot.lane.b32.xlu1 %v307_v7, %s1289_s7  ;;  %v315_v8 = vrot.slane %v307_v7, 6  ;;  %313 = vst.msk [vmem:[#allocation2] sm:$0x3] %vm312_vm1, %v307_v7 }
  0x95   : > { %321 = vrot.lane.b32.xlu0 %v307_v7, %s1290_s8  ;;  %340 = vst.msk [vmem:[#allocation2 + $0x10] sm:$0xc] %vm319_vm2, %v307_v7 }
  0x96   : > { %v325_v9 = vrot.slane %v315_v8, 4 }
  0x98   : > { %373 = vst.msk [vmem:[#allocation2 + $0x30] sm:$0x3] %vm312_vm1, %v325_v9 }
  0x99   : > { %v295_v10 = vpop.f32.mrf.mxu0 }
  0x9a   : > { %v1372_v11 = vpack.c.bf16 %v295_v10, %v295_v10 }
  0x9b   : > { %v303_v14 = vpop.f32.mrf.mxu2 }
  0x9c   : > { %351 = vrot.lane.b32.xlu1 %v307_v7, %s1291_s9  ;;  %336 = vrot.lane.b32.xlu2 %v325_v9, %s1288_s6  ;;  %v1377_v12 = vrot.slane %v1372_v11, 6  ;;  %422 = vst.msk [vmem:[#allocation2 + $0x4] sm:$0x3] %vm312_vm1, %v1372_v11  ;;  %v1411_v16 = vpack.c.bf16 %v303_v14, %v303_v14 }
  0x9d   : > { %360 = vrot.lane.b32.xlu0 %v307_v7, %s1292_s10  ;;  %468 = vst.msk [vmem:[#allocation2 + $0x14] sm:$0xc] %vm319_vm2, %v1372_v11 }
  0x9e   : > { %v1385_v13 = vrot.slane %v1377_v12, 4  ;;  %v1472_v26 = vrot.slane %v1411_v16, 6 }
  0xa0   : > { %499 = vst.msk [vmem:[#allocation2 + $0x34] sm:$0x3] %vm312_vm1, %v1385_v13  ;;  %v818_v27 = vrot.slane %v1472_v26, 4 }
  0xa1   : > { %v298_v17 = vpop.f32.mrf.mxu0 }
  0xa2   : > { %v1419_v18 = vpack.c.bf16 %v298_v17, %v298_v17 }
  0xa3   : > { %v305_v15 = vpop.f32.mrf.mxu2 }
  0xa4   : > { %341 = vrot.lane.b32.xlu2 %v325_v9, %s1293_s11  ;;  %326 = vrot.lane.b32.xlu1 %v325_v9, %s1292_s10  ;;  %546 = vst.msk [vmem:[#allocation2 + $0x8] sm:$0x3] %vm312_vm1, %v1419_v18  ;;  %v1444_v21 = vrot.slane %v1419_v18, 6 }
  0xa5   : > { %374 = vrot.lane.b32.xlu0 %v307_v7, %s1293_s11  ;;  %592 = vst.msk [vmem:[#allocation2 + $0x18] sm:$0xc] %vm319_vm2, %v1419_v18 }
  0xa6   : > { %v1450_v23 = vrot.slane %v1444_v21, 4 }
  0xa8   : > { %623 = vst.msk [vmem:[#allocation2 + $0x38] sm:$0x3] %vm312_vm1, %v1450_v23 }
  0xa9   : > { %v300_v19 = vpop.f32.mrf.mxu0 }
  0xaa   : > { %v1431_v20 = vpack.c.bf16 %v300_v19, %v300_v19 }
  0xac   : > { %356 = vrot.lane.b32.xlu2 %v325_v9, %s1294_s12  ;;  %364 = vrot.lane.b32.xlu1 %v325_v9, %s1289_s7  ;;  %670 = vst.msk [vmem:[#allocation2 + $0xc] sm:$0x3] %vm312_vm1, %v1431_v20  ;;  %v1447_v22 = vrot.slane %v1431_v20, 6 }
  0xad   : > { %316 = vrot.lane.b32.xlu0 %v315_v8, %s1293_s11  ;;  %716 = vst.msk [vmem:[#allocation2 + $0x1c] sm:$0xc] %vm319_vm2, %v1431_v20 }
  0xae   : > { %v1453_v24 = vrot.slane %v1447_v22, 4 }
  0xb0   : > { %747 = vst.msk [vmem:[#allocation2 + $0x3c] sm:$0x3] %vm312_vm1, %v1453_v24 }
  0xb4   : > { %378 = vrot.lane.b32.xlu1 %v325_v9, %s1290_s8  ;;  %383 = vrot.lane.b32.xlu2 %v1372_v11, %s1295_s13 }
  0xb5   : > { %346 = vrot.lane.b32.xlu0 %v325_v9, %s1296_s14 }
  0xbc   : > { %394 = vrot.lane.b32.xlu1 %v1372_v11, %s1297_s22  ;;  %451 = vrot.lane.b32.xlu2 %v1372_v11, %s1294_s12 }
  0xbd   : > { %402 = vrot.lane.b32.xlu0 %v1372_v11, %s1291_s9 }
  0xc4   : > { %443 = vrot.lane.b32.xlu1 %v1372_v11, %s1296_s14  ;;  %435 = vrot.lane.b32.xlu2 %v1372_v11, %s1298_s23 }
  0xc5   : > { %418 = vrot.lane.b32.xlu0 %v1372_v11, %s1288_s6 }
  0xcc   : > { %790 = vrot.lane.b32.xlu1 %v1411_v16, %s1288_s6  ;;  %500 = vrot.lane.b32.xlu2 %v1372_v11, %s1293_s11 }
  0xcd   : > { %410 = vrot.lane.b32.xlu0 %v1372_v11, %s1292_s10 }
  0xd4   : > { %406 = vrot.lane.b32.xlu1 %v1377_v12, %s1294_s12  ;;  %398 = vrot.lane.b32.xlu2 %v1377_v12, %s1296_s14 }
  0xd5   : > { %814 = vrot.lane.b32.xlu0 %v1411_v16, %s1294_s12 }
  0xdc   : > { %414 = vrot.lane.b32.xlu1 %v1377_v12, %s1289_s7  ;;  %447 = vrot.lane.b32.xlu2 %v1377_v12, %s1291_s9 }
  0xdd   : > { %427 = vrot.lane.b32.xlu0 %v1372_v11, %s1290_s8 }
  0xe4   : > { %423 = vrot.lane.b32.xlu2 %v1377_v12, %s1293_s11  ;;  %479 = vrot.lane.b32.xlu1 %v1385_v13, %s1297_s22 }
  0xe5   : > { %389 = vrot.lane.b32.xlu0 %v1377_v12, %s1298_s23 }
  0xec   : > { %474 = vrot.lane.b32.xlu1 %v1385_v13, %s1295_s13  ;;  %504 = vrot.lane.b32.xlu2 %v1385_v13, %s1290_s8 }
  0xed   : > { %439 = vrot.lane.b32.xlu0 %v1377_v12, %s1297_s22 }
  0xee   : > { %v369_v25 = vpop.permute.xlu2 %368 }
  0xf4   : > { %469 = vrot.lane.b32.xlu1 %v1385_v13, %s1293_s11  ;;  %824 = vrot.lane.b32.xlu2 %v818_v27, %s1297_s22 }
  0xf5   : > { %431 = vrot.lane.b32.xlu0 %v1377_v12, %s1295_s13 }
  0xf6   : > { %v337_v28 = vpop.permute.xlu2 %336 }
  0xfc   : > { %493 = vrot.lane.b32.xlu1 %v1385_v13, %s1289_s7  ;;  %534 = vrot.lane.b32.xlu2 %v1419_v18, %s1292_s10 }
  0xfd   : > { %575 = vrot.lane.b32.xlu0 %v1419_v18, %s1294_s12 }
  0xfe   : > { %v342_v29 = vpop.permute.xlu2 %341 }
  0xff   : > { %344 = vst.msk [vmem:[#allocation2 + $0x20] sm:$0x3] %vm312_vm1, %v342_v29 }
 0x104   : > { %559 = vrot.lane.b32.xlu2 %v1419_v18, %s1298_s23  ;;  %542 = vrot.lane.b32.xlu1 %v1419_v18, %s1288_s6 }
 0x105   : > { %551 = vrot.lane.b32.xlu0 %v1419_v18, %s1290_s8 }
 0x106   : > { %v332_v30 = vpop.permute.xlu1 %331  ;;  %v357_v31 = vpop.permute.xlu2 %356 }
 0x107   : > { %v322_v32 = vpop.permute.xlu0 %321 }
 0x108   : > { %324 = vst.msk [vmem:[#allocation2 + $0x10] sm:$0x3] %vm312_vm1, %v322_v32 }
 0x109   : > { %345 = vst.msk [vmem:[#allocation2 + $0x20] sm:$0xc] %vm319_vm2, %v322_v32 }
 0x10a   : > { %339 = vst.msk [vmem:[#allocation2 + $0x10] sm:$0x3] %vm329_vm3, %v337_v28 }
 0x10b   : > { %359 = vst.msk [vmem:[#allocation2 + $0x10] sm:$0x3] %vm349_vm4, %v357_v31 }
 0x10c   : > { %526 = vrot.lane.b32.xlu1 %v1419_v18, %s1291_s9  ;;  %530 = vrot.lane.b32.xlu2 %v1444_v21, %s1294_s12  ;;  %371 = vst.msk [vmem:[#allocation2 + $0x20] sm:$0xc] %vm334_vm5, %v369_v25 }
 0x10d   : > { %538 = vrot.lane.b32.xlu0 %v1444_v21, %s1289_s7 }
 0x10e   : > { %v352_v33 = vpop.permute.xlu1 %351  ;;  %v384_v34 = vpop.permute.xlu2 %383 }
 0x10f   : > { %v361_v35 = vpop.permute.xlu0 %360 }
 0x110   : > { %363 = vst.msk [vmem:[#allocation2 + $0x10] sm:$0xc] %vm334_vm5, %v361_v35 }
 0x114   : > { %567 = vrot.lane.b32.xlu1 %v1419_v18, %s1296_s14  ;;  %571 = vrot.lane.b32.xlu2 %v1444_v21, %s1291_s9 }
 0x115   : > { %563 = vrot.lane.b32.xlu0 %v1444_v21, %s1297_s22 }
 0x116   : > { %v327_v36 = vpop.permute.xlu1 %326  ;;  %v452_v37 = vpop.permute.xlu2 %451 }
 0x117   : > { %v375_v38 = vpop.permute.xlu0 %374  ;;  %330 = vst.msk [vmem:[#allocation2] sm:$0x3] %vm329_vm3, %v327_v36 }
 0x118   : > { %377 = vst.msk [vmem:[#allocation2 + $0x30] sm:$0xc] %vm319_vm2, %v375_v38 }
 0x11c   : > { %624 = vrot.lane.b32.xlu1 %v1419_v18, %s1293_s11  ;;  %603 = vrot.lane.b32.xlu2 %v1450_v23, %s1297_s22 }
 0x11d   : > { %593 = vrot.lane.b32.xlu0 %v1450_v23, %s1293_s11 }
 0x11e   : > { %v365_v39 = vpop.permute.xlu1 %364  ;;  %v1521_v40 = vpop.permute.xlu2 %435 }
 0x11f   : > { %v317_v41 = vpop.permute.xlu0 %316  ;;  %367 = vst.msk [vmem:[#allocation2 + $0x20] sm:$0x3] %vm329_vm3, %v365_v39 }
 0x120   : > { %320 = vst.msk [vmem:[#allocation2] sm:$0xc] %vm319_vm2, %v317_v41 }
 0x121   : > { %335 = vst.msk [vmem:[#allocation2] sm:$0xc] %vm334_vm5, %v332_v30 }
 0x122   : > { %355 = vst.msk [vmem:[#allocation2] sm:$0xc] %vm354_vm6, %v352_v33 }
 0x124   : > { %598 = vrot.lane.b32.xlu1 %v1450_v23, %s1295_s13  ;;  %628 = vrot.lane.b32.xlu2 %v1450_v23, %s1290_s8 }
 0x125   : > { %666 = vrot.lane.b32.xlu0 %v1431_v20, %s1288_s6 }
 0x126   : > { %v379_v42 = vpop.permute.xlu1 %378  ;;  %v501_v43 = vpop.permute.xlu2 %500 }
 0x127   : > { %v347_v44 = vpop.permute.xlu0 %346  ;;  %381 = vst.msk [vmem:[#allocation2 + $0x40] sm:$0x3] %vm312_vm1, %v379_v42 }
 0x128   : > { %350 = vst.msk [vmem:[#allocation2] sm:$0x3] %vm349_vm4, %v347_v44 }
 0x129   : > { %387 = vst.msk [vmem:[#allocation2] sm:$0x3] %vm386_vm7, %v384_v34 }
 0x12a   : > { %503 = vst.msk [vmem:[#allocation2 + $0x34] sm:$0xc] %vm319_vm2, %v501_v43 }
 0x12c   : > { %617 = vrot.lane.b32.xlu2 %v1450_v23, %s1289_s7  ;;  %662 = vrot.lane.b32.xlu1 %v1447_v22, %s1289_s7 }
 0x12d   : > { %658 = vrot.lane.b32.xlu0 %v1431_v20, %s1292_s10 }
 0x12e   : > { %v395_v45 = vpop.permute.xlu1 %394  ;;  %v399_v46 = vpop.permute.xlu2 %398 }
 0x12f   : > { %v1543_v47 = vpop.permute.xlu0 %402  ;;  %397 = vst.msk [vmem:[#allocation2 + $0x10] sm:$0x3] %vm386_vm7, %v395_v45 }
 0x130   : > { %405 = vst.msk [vmem:[#allocation2 + $0x20] sm:$0x3] %vm349_vm4, %v1543_v47 }
 0x131   : > { %438 = vst.msk [vmem:[#allocation2 + $0x20] sm:$0x3] %vm386_vm7, %v1521_v40 }
 0x132   : > { %401 = vst.msk [vmem:[#allocation2 + $0x10] sm:$0xc] %vm354_vm6, %v399_v46 }
 0x134   : > { %699 = vrot.lane.b32.xlu2 %v1431_v20, %s1294_s12  ;;  %727 = vrot.lane.b32.xlu1 %v1453_v24, %s1297_s22 }
 0x135   : > { %752 = vrot.lane.b32.xlu0 %v1453_v24, %s1290_s8 }
 0x136   : > { %v444_v48 = vpop.permute.xlu1 %443  ;;  %v448_v49 = vpop.permute.xlu2 %447 }
 0x137   : > { %v419_v50 = vpop.permute.xlu0 %418 }
 0x138   : > { %421 = vst.msk [vmem:[#allocation2 + $0x40] sm:$0x3] %vm329_vm3, %v419_v50 }
 0x139   : > { %454 = vst.msk [vmem:[#allocation2 + $0x40] sm:$0x3] %vm349_vm4, %v452_v37 }
 0x13c   : > { %691 = vrot.lane.b32.xlu2 %v1431_v20, %s1296_s14  ;;  %654 = vrot.lane.b32.xlu1 %v1447_v22, %s1294_s12 }
 0x13d   : > { %650 = vrot.lane.b32.xlu0 %v1431_v20, %s1291_s9 }
 0x13e   : > { %v1565_v51 = vpop.permute.xlu1 %790  ;;  %v424_v52 = vpop.permute.xlu2 %423 }
 0x13f   : > { %v411_v53 = vpop.permute.xlu0 %410  ;;  %426 = vst.msk [vmem:[#allocation2 + $0x4] sm:$0xc] %vm319_vm2, %v424_v52 }
 0x140   : > { %413 = vst.msk [vmem:[#allocation2 + $0x30] sm:$0x3] %vm329_vm3, %v411_v53 }
 0x141   : > { %492 = vst.msk [vmem:[#allocation2 + $0x14] sm:$0xc] %vm334_vm5, %v411_v53 }
 0x142   : > { %446 = vst.msk [vmem:[#allocation2 + $0x30] sm:$0x3] %vm349_vm4, %v444_v48 }
 0x144   : > { %460 = vrot.lane.b32.xlu2 %v1372_v11, %s1289_s7  ;;  %456 = vrot.lane.b32.xlu1 %v1385_v13, %s1292_s10 }
 0x145   : > { %695 = vrot.lane.b32.xlu0 %v1447_v22, %s1291_s9 }
 0x146   : > { %v407_v54 = vpop.permute.xlu1 %406  ;;  %v505_v55 = vpop.permute.xlu2 %504 }
 0x147   : > { %v1577_v56 = vpop.permute.xlu0 %814  ;;  %409 = vst.msk [vmem:[#allocation2 + $0x20] sm:$0xc] %vm354_vm6, %v407_v54 }
 0x148   : > { %507 = vst.msk [vmem:[#allocation2 + $0x44] sm:$0x3] %vm312_vm1, %v505_v55 }
 0x14c   : > { %687 = vrot.lane.b32.xlu2 %v1447_v22, %s1297_s22  ;;  %683 = vrot.lane.b32.xlu1 %v1431_v20, %s1298_s23 }
 0x14d   : > { %464 = vrot.lane.b32.xlu0 %v1385_v13, %s1288_s6 }
 0x14e   : > { %v415_v57 = vpop.permute.xlu1 %414  ;;  %v1587_v58 = vpop.permute.xlu2 %824 }
 0x14f   : > { %v428_v59 = vpop.permute.xlu0 %427  ;;  %417 = vst.msk [vmem:[#allocation2 + $0x30] sm:$0xc] %vm334_vm5, %v415_v57 }
 0x150   : > { %430 = vst.msk [vmem:[#allocation2 + $0x14] sm:$0x3] %vm312_vm1, %v428_v59 }
 0x151   : > { %473 = vst.msk [vmem:[#allocation2 + $0x24] sm:$0xc] %vm319_vm2, %v428_v59 }
 0x152   : > { %497 = vst.msk [vmem:[#allocation2 + $0x24] sm:$0xc] %vm334_vm5, %v419_v50 }
 0x153   : > { %450 = vst.msk [vmem:[#allocation2 + $0x30] sm:$0xc] %vm354_vm6, %v448_v49 }
 0x154   : > { %478 = vst.msk [vmem:[#allocation2 + $0x30] sm:$0xc] %vm392_vm8, %v1521_v40  ;;  %488 = vrot.lane.b32.xlu2 %v1385_v13, %s1294_s12  ;;  %483 = vrot.lane.b32.xlu1 %v1385_v13, %s1296_s14 }
 0x155   : > { %722 = vrot.lane.b32.xlu0 %v1453_v24, %s1295_s13 }
 0x156   : > { %v480_v60 = vpop.permute.xlu1 %479  ;;  %v535_v61 = vpop.permute.xlu2 %534 }
 0x157   : > { %v390_v62 = vpop.permute.xlu0 %389  ;;  %482 = vst.msk [vmem:[#allocation2 + $0x40] sm:$0x3] %vm386_vm7, %v480_v60 }
 0x158   : > { %393 = vst.msk [vmem:[#allocation2] sm:$0xc] %vm392_vm8, %v390_v62 }
 0x159   : > { %537 = vst.msk [vmem:[#allocation2 + $0x34] sm:$0x3] %vm329_vm3, %v535_v61 }
 0x15a   : > { %616 = vst.msk [vmem:[#allocation2 + $0x18] sm:$0xc] %vm334_vm5, %v535_v61 }
 0x15c   : > { %509 = vrot.lane.b32.xlu2 %v1419_v18, %s1295_s13  ;;  %547 = vrot.lane.b32.xlu1 %v1444_v21, %s1293_s11 }
 0x15d   : > { %522 = vrot.lane.b32.xlu0 %v1444_v21, %s1296_s14 }
 0x15e   : > { %v475_v63 = vpop.permute.xlu1 %474  ;;  %v560_v0 = vpop.permute.xlu2 %559 }
 0x15f   : > { %v440_v1 = vpop.permute.xlu0 %439  ;;  %477 = vst.msk [vmem:[#allocation2 + $0x30] sm:$0x3] %vm386_vm7, %v475_v63  ;;  %v1148_v35 = vld [vmem:[#allocation2] sm:$0xf] }
 0x160   : > { %442 = vst.msk [vmem:[#allocation2 + $0x20] sm:$0xc] %vm392_vm8, %v440_v1 }
 0x164   : > { %555 = vrot.lane.b32.xlu2 %v1444_v21, %s1295_s13  ;;  %518 = vrot.lane.b32.xlu1 %v1419_v18, %s1297_s22 }
 0x165   : > { %514 = vrot.lane.b32.xlu0 %v1444_v21, %s1298_s23 }
 0x166   : > { %v470_v2 = vpop.permute.xlu1 %469  ;;  %v531_v3 = vpop.permute.xlu2 %530  ;;  %v1193_v28 = vld [vmem:[#allocation2 + $0x2c] sm:$0xf0] }
 0x167   : > { %v432_v4 = vpop.permute.xlu0 %431  ;;  %472 = vst.msk [vmem:[#allocation2 + $0x24] sm:$0x3] %vm312_vm1, %v470_v2  ;;  %v1164_v31 = vld [vmem:[#allocation2 + $0x20] sm:$0xf] }
 0x168   : > { %434 = vst.msk [vmem:[#allocation2 + $0x10] sm:$0xc] %vm392_vm8, %v432_v4  ;;  %v1165_v32 = vor.u32 %v1193_v28, %v1164_v31 }
 0x169   : > { %533 = vst.msk [vmem:[#allocation2 + $0x24] sm:$0xc] %vm354_vm6, %v531_v3 }
 0x16c   : > { %588 = vrot.lane.b32.xlu2 %v1450_v23, %s1288_s6  ;;  %584 = vrot.lane.b32.xlu1 %v1419_v18, %s1289_s7 }
 0x16d   : > { %580 = vrot.lane.b32.xlu0 %v1450_v23, %s1292_s10 }
 0x16e   : > { %v494_v5 = vpop.permute.xlu1 %493  ;;  %v572_v6 = vpop.permute.xlu2 %571 }
 0x16f   : > { %496 = vst.msk [vmem:[#allocation2 + $0x24] sm:$0x3] %vm329_vm3, %v494_v5  ;;  %v576_v7 = vpop.permute.xlu0 %575  ;;  %v1189_v33 = vld [vmem:[#allocation2 + $0xc] sm:$0xf0] }
 0x170   : > { %v1149_v38 = vor.u32 %v1189_v33, %v1148_v35 }
 0x174   : > { %646 = vrot.lane.b32.xlu2 %v1447_v22, %s1296_s14  ;;  %612 = vrot.lane.b32.xlu1 %v1450_v23, %s1294_s12 }
 0x175   : > { %607 = vrot.lane.b32.xlu0 %v1450_v23, %s1296_s14 }
 0x176   : > { %v543_v8 = vpop.permute.xlu1 %542  ;;  %v604_v9 = vpop.permute.xlu2 %603 }
 0x177   : > { %v552_v10 = vpop.permute.xlu0 %551  ;;  %545 = vst.msk [vmem:[#allocation2 + $0x44] sm:$0x3] %vm329_vm3, %v543_v8 }
 0x178   : > { %554 = vst.msk [vmem:[#allocation2 + $0x18] sm:$0x3] %vm312_vm1, %v552_v10 }
 0x179   : > { %597 = vst.msk [vmem:[#allocation2 + $0x28] sm:$0xc] %vm319_vm2, %v552_v10 }
 0x17a   : > { %621 = vst.msk [vmem:[#allocation2 + $0x28] sm:$0xc] %vm334_vm5, %v543_v8 }
 0x17b   : > { %578 = vst.msk [vmem:[#allocation2 + $0x44] sm:$0x3] %vm349_vm4, %v576_v7 }
 0x17c   : > { %606 = vst.msk [vmem:[#allocation2 + $0x44] sm:$0x3] %vm386_vm7, %v604_v9  ;;  %642 = vrot.lane.b32.xlu2 %v1431_v20, %s1297_s22  ;;  %638 = vrot.lane.b32.xlu1 %v1447_v22, %s1298_s23 }
 0x17d   : > { %633 = vrot.lane.b32.xlu0 %v1431_v20, %s1295_s13 }
 0x17e   : > { %v1648_v11 = vpop.permute.xlu1 %526  ;;  %v629_v12 = vpop.permute.xlu2 %628 }
 0x17f   : > { %529 = vst.msk [vmem:[#allocation2 + $0x24] sm:$0x3] %vm349_vm4, %v1648_v11  ;;  %v539_v13 = vpop.permute.xlu0 %538 }
 0x180   : > { %562 = vst.msk [vmem:[#allocation2 + $0x24] sm:$0x3] %vm386_vm7, %v560_v0 }
 0x181   : > { %541 = vst.msk [vmem:[#allocation2 + $0x34] sm:$0xc] %vm334_vm5, %v539_v13 }
 0x182   : > { %574 = vst.msk [vmem:[#allocation2 + $0x34] sm:$0xc] %vm354_vm6, %v572_v6 }
 0x183   : > { %602 = vst.msk [vmem:[#allocation2 + $0x34] sm:$0xc] %vm392_vm8, %v560_v0  ;;  %v837_v14 = vld [vmem:[#allocation2 + $0x40] sm:$0x33] }
 0x184   : > { %631 = vst.msk [vmem:[#allocation2 + $0x48] sm:$0x3] %vm312_vm1, %v629_v12  ;;  %717 = vrot.lane.b32.xlu2 %v1453_v24, %s1293_s11  ;;  %675 = vrot.lane.b32.xlu1 %v1431_v20, %s1290_s8  ;;  %v865_v15 = vunpack.c.l.b16 %v837_v14  ;;  %v866_v17 = vunpack.c.h.b16 %v837_v14 }
 0x185   : > { %679 = vrot.lane.b32.xlu0 %v1447_v22, %s1295_s13 }
 0x186   : > { %v568_v18 = vpop.permute.xlu1 %567  ;;  %v877_v19 = vpack.c.b16 %v865_v15, %v865_v15  ;;  %v878_v21 = vpack.c.b16 %v866_v17, %v866_v17  ;;  %v618_v23 = vpop.permute.xlu2 %617 }
 0x187   : > { %570 = vst.msk [vmem:[#allocation2 + $0x34] sm:$0x3] %vm349_vm4, %v568_v18  ;;  %v564_v25 = vpop.permute.xlu0 %563 }
 0x188   : > { %566 = vst.msk [vmem:[#allocation2 + $0x24] sm:$0xc] %vm392_vm8, %v564_v25  ;;  %v895_v29 = vsel %vm893_vm9, %v877_v19, 0  ;;  %v898_v30 = vsel %vm893_vm9, %v878_v21, 0 }
 0x189   : > { %911 = vmatpush.bf16.msra.mxu1 %v895_v29  ;;  %924 = vmatpush.bf16.msrb.mxu2 %v898_v30 }
 0x18c   : > { %782 = vrot.lane.b32.xlu2 %v1411_v16, %s1292_s10  ;;  %741 = vrot.lane.b32.xlu1 %v1453_v24, %s1289_s7 }
 0x18d   : > { %912 = vmatpush.bf16.msra.mxu1 %v1165_v32  ;;  %748 = vrot.lane.b32.xlu0 %v1431_v20, %s1293_s11 }
 0x18e   : > { %v625_v34 = vpop.permute.xlu1 %624  ;;  %v700_v36 = vpop.permute.xlu2 %699 }
 0x18f   : > { %627 = vst.msk [vmem:[#allocation2 + $0x38] sm:$0xc] %vm319_vm2, %v625_v34  ;;  %v594_v37 = vpop.permute.xlu0 %593  ;;  %v1191_v44 = vld [vmem:[#allocation2 + $0x24] sm:$0xf] }
 0x190   : > { %596 = vst.msk [vmem:[#allocation2 + $0x28] sm:$0x3] %vm312_vm1, %v594_v37 }
 0x191   : > { %620 = vst.msk [vmem:[#allocation2 + $0x28] sm:$0x3] %vm329_vm3, %v618_v23  ;;  %913 = vmatpush.bf16.msra.mxu1 %v1149_v38 }
 0x194   : > { %778 = vrot.lane.b32.xlu2 %v1472_v26, %s1294_s12  ;;  %774 = vrot.lane.b32.xlu1 %v1411_v16, %s1291_s9 }
 0x195   : > { %786 = vrot.lane.b32.xlu0 %v1472_v26, %s1289_s7 }
 0x196   : > { %v599_v39 = vpop.permute.xlu1 %598  ;;  %v692_v40 = vpop.permute.xlu2 %691 }
 0x197   : > { %601 = vst.msk [vmem:[#allocation2 + $0x34] sm:$0x3] %vm386_vm7, %v599_v39  ;;  %v1683_v41 = vpop.permute.xlu0 %666  ;;  %v828_v39 = vld [vmem:[%s1834_s1] sm:$0xf] }
 0x198   : > { %669 = vst.msk [vmem:[#allocation2 + $0x48] sm:$0x3] %vm329_vm3, %v1683_v41  ;;  %1178 = vmatmul.msk.bf16.vlgmr.msra.gmra.mxu1 %vm889_vm10, %v828_v39 }
 0x199   : > { %702 = vst.msk [vmem:[#allocation2 + $0x48] sm:$0x3] %vm349_vm4, %v700_v36 }
 0x19c   : > { %798 = vrot.lane.b32.xlu2 %v1411_v16, %s1298_s23  ;;  %810 = vrot.lane.b32.xlu1 %v1472_v26, %s1291_s9 }
 0x19d   : > { %806 = vrot.lane.b32.xlu0 %v1411_v16, %s1296_s14 }
 0x19e   : > { %v461_v42 = vpop.permute.xlu2 %460  ;;  %v663_v43 = vpop.permute.xlu1 %662  ;;  %v1166_v45 = vld [vmem:[#allocation2 + $0x30] sm:$0xf0] }
 0x19f   : > { %463 = vst.msk [vmem:[#allocation2 + $0x4] sm:$0xc] %vm334_vm5, %v461_v42  ;;  %v659_v46 = vpop.permute.xlu0 %658  ;;  %v1169_v48 = vor.u32 %v1191_v44, %v1166_v45 }
 0x1a0   : > { %487 = vst.msk [vmem:[#allocation2 + $0x4] sm:$0xc] %vm354_vm6, %v1543_v47 }
 0x1a1   : > { %661 = vst.msk [vmem:[#allocation2 + $0x38] sm:$0x3] %vm329_vm3, %v659_v46  ;;  %925 = vmatpush.bf16.msrb.mxu2 %v1169_v48 }
 0x1a2   : > { %740 = vst.msk [vmem:[#allocation2 + $0x1c] sm:$0xc] %vm334_vm5, %v659_v46 }
 0x1a3   : > { %694 = vst.msk [vmem:[#allocation2 + $0x38] sm:$0x3] %vm349_vm4, %v692_v40 }
 0x1a4   : > { %665 = vst.msk [vmem:[#allocation2 + $0x38] sm:$0xc] %vm334_vm5, %v663_v43  ;;  %671 = vrot.lane.b32.xlu2 %v1447_v22, %s1293_s11  ;;  %819 = vrot.lane.b32.xlu1 %v818_v27, %s1295_s13 }
 0x1a5   : > { %802 = vrot.lane.b32.xlu0 %v1472_v26, %s1297_s22 }
 0x1a6   : > { %v688_v47 = vpop.permute.xlu2 %687  ;;  %v728_v49 = vpop.permute.xlu1 %727 }
 0x1a7   : > { %730 = vst.msk [vmem:[#allocation2 + $0x48] sm:$0x3] %vm386_vm7, %v728_v49  ;;  %v753_v50 = vpop.permute.xlu0 %752 }
 0x1a8   : > { %755 = vst.msk [vmem:[#allocation2 + $0x4c] sm:$0x3] %vm312_vm1, %v753_v50 }
 0x1a9   : > { %793 = vst.msk [vmem:[#allocation2 + $0x4c] sm:$0x3] %vm329_vm3, %v1565_v51 }
 0x1aa   : > { %817 = vst.msk [vmem:[#allocation2 + $0x4c] sm:$0x3] %vm349_vm4, %v1577_v56 }
 0x1ab   : > { %827 = vst.msk [vmem:[#allocation2 + $0x4c] sm:$0x3] %vm386_vm7, %v1587_v58 }
 0x1ac   : > { %712 = vrot.lane.b32.xlu2 %v1453_v24, %s1288_s6  ;;  %708 = vrot.lane.b32.xlu1 %v1431_v20, %s1289_s7  ;;  %s232_s6 = scalar_lea.vmem %s1836_s3, %s1126_s29  ;;  %s1127_s7 = sshll.u32 %s1849_s16, 1 }
 0x1ad   : > { %704 = vrot.lane.b32.xlu0 %v1453_v24, %s1292_s10  ;;  %s239_s8 = sadd.s32 %s1127_s7, %s1853_s15 }
 0x1ae   : > { %v489_v22 = vpop.permute.xlu2 %488  ;;  %v655_v27 = vpop.permute.xlu1 %654  ;;  %s1128_s9 = sshll.u32 %s239_s8, 3 }
 0x1af   : > { %657 = vst.msk [vmem:[#allocation2 + $0x28] sm:$0xc] %vm354_vm6, %v655_v27  ;;  %v1723_v51 = vpop.permute.xlu0 %650 }
 0x1b0   : > { %690 = vst.msk [vmem:[#allocation2 + $0x28] sm:$0xc] %vm392_vm8, %v688_v47 }
 0x1b1   : > { %653 = vst.msk [vmem:[#allocation2 + $0x28] sm:$0x3] %vm349_vm4, %v1723_v51 }
 0x1b2   : > { %v838_v52 = vld [vmem:[#allocation2 + $0x48] sm:$0x33] }
 0x1b3   : > { %v867_v53 = vunpack.c.l.b16 %v838_v52  ;;  %v868_v54 = vunpack.c.h.b16 %v838_v52 }
 0x1b4   : > { %770 = vrot.lane.b32.xlu2 %v1472_v26, %s1296_s14  ;;  %736 = vrot.lane.b32.xlu1 %v1453_v24, %s1294_s12  ;;  %s241_s12 = scalar_lea.vmem %s1837_s4, %s1128_s9 }
 0x1b5   : > { %731 = vrot.lane.b32.xlu0 %v1453_v24, %s1296_s14  ;;  %v879_v20 = vpack.c.b16 %v867_v53, %v867_v53  ;;  %v880_v55 = vpack.c.b16 %v868_v54, %v868_v54 }
 0x1b6   : > { %v510_v56 = vpop.permute.xlu2 %509  ;;  %v457_v57 = vpop.permute.xlu1 %456 }
 0x1b7   : > { %459 = vst.msk [vmem:[#allocation2 + $0x4] sm:$0x3] %vm329_vm3, %v457_v57  ;;  %v696_v58 = vpop.permute.xlu0 %695  ;;  %v901_v59 = vsel %vm893_vm9, %v879_v20, 0  ;;  %v904_v60 = vsel %vm893_vm9, %v880_v55, 0 }
 0x1b8   : > { %698 = vst.msk [vmem:[#allocation2 + $0x38] sm:$0xc] %vm354_vm6, %v696_v58  ;;  %937 = vmatpush.bf16.msra.mxu3 %v901_v59  ;;  %950 = vmatpush.bf16.msrb.mxu1 %v904_v60 }
 0x1bc   : > { %766 = vrot.lane.b32.xlu2 %v1411_v16, %s1297_s22  ;;  %762 = vrot.lane.b32.xlu1 %v1472_v26, %s1298_s23 }
 0x1bd   : > { %757 = vrot.lane.b32.xlu0 %v1411_v16, %s1295_s13 }
 0x1be   : > { %v556_v24 = vpop.permute.xlu2 %555  ;;  %v684_v61 = vpop.permute.xlu1 %683 }
 0x1bf   : > { %686 = vst.msk [vmem:[#allocation2 + $0x28] sm:$0x3] %vm386_vm7, %v684_v61  ;;  %v465_v62 = vpop.permute.xlu0 %464 }
 0x1c0   : > { %726 = vst.msk [vmem:[#allocation2 + $0x38] sm:$0xc] %vm392_vm8, %v684_v61 }
 0x1c1   : > { %467 = vst.msk [vmem:[#allocation2 + $0x14] sm:$0x3] %vm329_vm3, %v465_v62 }
 0x1c2   : > { %491 = vst.msk [vmem:[#allocation2 + $0x14] sm:$0x3] %vm349_vm4, %v489_v22 }
 0x1c5   : > { %794 = vrot.lane.b32.xlu0 %v1472_v26, %s1295_s13 }
 0x1c6   : > { %v589_v63 = vpop.permute.xlu2 %588  ;;  %v484_v0 = vpop.permute.xlu1 %483  ;;  %v1172_v26 = vld [vmem:[#allocation2 + $0x28] sm:$0xf] }
 0x1c7   : > { %591 = vst.msk [vmem:[#allocation2 + $0x18] sm:$0x3] %vm329_vm3, %v589_v63  ;;  %v723_v1 = vpop.permute.xlu0 %722 }
 0x1c8   : > { %486 = vst.msk [vmem:[#allocation2 + $0x4] sm:$0x3] %vm349_vm4, %v484_v0 }
 0x1c9   : > { %512 = vst.msk [vmem:[#allocation2 + $0x4] sm:$0x3] %vm386_vm7, %v510_v56 }
 0x1ca   : > { %725 = vst.msk [vmem:[#allocation2 + $0x38] sm:$0x3] %vm386_vm7, %v723_v1 }
 0x1ce   : > { %v647_v16 = vpop.permute.xlu2 %646  ;;  %v548_v2 = vpop.permute.xlu1 %547 }
 0x1cf   : > { %649 = vst.msk [vmem:[#allocation2 + $0x18] sm:$0xc] %vm354_vm6, %v647_v16  ;;  %v523_v3 = vpop.permute.xlu0 %522 }
 0x1d0   : > { %550 = vst.msk [vmem:[#allocation2 + $0x8] sm:$0xc] %vm319_vm2, %v548_v2 }
 0x1d1   : > { %525 = vst.msk [vmem:[#allocation2 + $0x14] sm:$0xc] %vm354_vm6, %v523_v3  ;;  %v1194_v4 = vld [vmem:[#allocation2 + $0x34] sm:$0xf0] }
 0x1d2   : > { %558 = vst.msk [vmem:[#allocation2 + $0x14] sm:$0xc] %vm392_vm8, %v556_v24  ;;  %v1173_v5 = vor.u32 %v1194_v4, %v1172_v26 }
 0x1d4   : > { %938 = vmatpush.bf16.msra.mxu3 %v1173_v5 }
 0x1d6   : > { %v643_v6 = vpop.permute.xlu2 %642  ;;  %v519_v7 = vpop.permute.xlu1 %518 }
 0x1d7   : > { %521 = vst.msk [vmem:[#allocation2 + $0x14] sm:$0x3] %vm386_vm7, %v519_v7  ;;  %v515_v8 = vpop.permute.xlu0 %514 }
 0x1d8   : > { %517 = vst.msk [vmem:[#allocation2 + $0x4] sm:$0xc] %vm392_vm8, %v515_v8 }
 0x1de   : > { %v718_v9 = vpop.permute.xlu2 %717  ;;  %v585_v10 = vpop.permute.xlu1 %584  ;;  %v1150_v12 = vld [vmem:[#allocation2 + $0x10] sm:$0xf0] }
 0x1df   : > { %720 = vst.msk [vmem:[#allocation2 + $0x2c] sm:$0x3] %vm312_vm1, %v718_v9  ;;  %v581_v13 = vpop.permute.xlu0 %580  ;;  %v1187_v14 = vld [vmem:[#allocation2 + $0x4] sm:$0xf] }
 0x1e0   : > { %587 = vst.msk [vmem:[#allocation2 + $0x8] sm:$0xc] %vm334_vm5, %v585_v10  ;;  %v1153_v15 = vor.u32 %v1187_v14, %v1150_v12 }
 0x1e1   : > { %611 = vst.msk [vmem:[#allocation2 + $0x8] sm:$0xc] %vm354_vm6, %v1648_v11 }
 0x1e2   : > { %583 = vst.msk [vmem:[#allocation2 + $0x8] sm:$0x3] %vm329_vm3, %v581_v13  ;;  %926 = vmatpush.bf16.msrb.mxu2 %v1153_v15 }
 0x1e5   : > { %1179 = vmatmul.msk.bf16.vlgmr.msrb.gmra.mxu2 %vm889_vm10, %v828_v39 }
 0x1e6   : > { %v783_v17 = vpop.permute.xlu2 %782  ;;  %v613_v18 = vpop.permute.xlu1 %612 }
 0x1e7   : > { %785 = vst.msk [vmem:[#allocation2 + $0x3c] sm:$0x3] %vm329_vm3, %v783_v17  ;;  %v608_v19 = vpop.permute.xlu0 %607 }
 0x1e8   : > { %615 = vst.msk [vmem:[#allocation2 + $0x18] sm:$0x3] %vm349_vm4, %v613_v18 }
 0x1e9   : > { %645 = vst.msk [vmem:[#allocation2 + $0x18] sm:$0x3] %vm386_vm7, %v643_v6 }
 0x1ea   : > { %610 = vst.msk [vmem:[#allocation2 + $0x8] sm:$0x3] %vm349_vm4, %v608_v19 }
 0x1ee   : > { %v779_v21 = vpop.permute.xlu2 %778  ;;  %v639_v23 = vpop.permute.xlu1 %638 }
 0x1ef   : > { %641 = vst.msk [vmem:[#allocation2 + $0x8] sm:$0xc] %vm392_vm8, %v639_v23  ;;  %v634_v25 = vpop.permute.xlu0 %633 }
 0x1f0   : > { %636 = vst.msk [vmem:[#allocation2 + $0x8] sm:$0x3] %vm386_vm7, %v634_v25 }
 0x1f6   : > { %v799_v11 = vpop.permute.xlu2 %798  ;;  %v676_v28 = vpop.permute.xlu1 %675 }
 0x1f7   : > { %678 = vst.msk [vmem:[#allocation2 + $0x1c] sm:$0x3] %vm312_vm1, %v676_v28  ;;  %v680_v29 = vpop.permute.xlu0 %679  ;;  %v1156_v33 = vld [vmem:[#allocation2 + $0x8] sm:$0xf] }
 0x1f8   : > { %721 = vst.msk [vmem:[#allocation2 + $0x2c] sm:$0xc] %vm319_vm2, %v676_v28 }
 0x1f9   : > { %745 = vst.msk [vmem:[#allocation2 + $0x2c] sm:$0xc] %vm334_vm5, %v1683_v41 }
 0x1fa   : > { %781 = vst.msk [vmem:[#allocation2 + $0x2c] sm:$0xc] %vm354_vm6, %v779_v21 }
 0x1fb   : > { %682 = vst.msk [vmem:[#allocation2 + $0x18] sm:$0xc] %vm392_vm8, %v680_v29 }
 0x1fe   : > { %v672_v30 = vpop.permute.xlu2 %671  ;;  %v742_v31 = vpop.permute.xlu1 %741 }
 0x1ff   : > { %674 = vst.msk [vmem:[#allocation2 + $0xc] sm:$0xc] %vm319_vm2, %v672_v30  ;;  %v749_v32 = vpop.permute.xlu0 %748 }
 0x200   : > { %744 = vst.msk [vmem:[#allocation2 + $0x2c] sm:$0x3] %vm329_vm3, %v742_v31 }
 0x201   : > { %751 = vst.msk [vmem:[#allocation2 + $0x3c] sm:$0xc] %vm319_vm2, %v749_v32 }
 0x202   : > { %v1190_v34 = vld [vmem:[#allocation2 + $0x14] sm:$0xf0] }
 0x203   : > { %v1157_v35 = vor.u32 %v1190_v34, %v1156_v33 }
 0x205   : > { %939 = vmatpush.bf16.msra.mxu3 %v1157_v35 }
 0x206   : > { %v713_v36 = vpop.permute.xlu2 %712  ;;  %v775_v37 = vpop.permute.xlu1 %774 }
 0x207   : > { %715 = vst.msk [vmem:[#allocation2 + $0x1c] sm:$0x3] %vm329_vm3, %v713_v36  ;;  %v787_v38 = vpop.permute.xlu0 %786 }
 0x208   : > { %777 = vst.msk [vmem:[#allocation2 + $0x2c] sm:$0x3] %vm349_vm4, %v775_v37  ;;  %1180 = vmatmul.msk.bf16.vlgmr.msra.gmra.mxu3 %vm889_vm10, %v828_v39 }
 0x209   : > { %801 = vst.msk [vmem:[#allocation2 + $0x2c] sm:$0x3] %vm386_vm7, %v799_v11 }
 0x20a   : > { %789 = vst.msk [vmem:[#allocation2 + $0x3c] sm:$0xc] %vm334_vm5, %v787_v38 }
 0x20e   : > { %v771_v40 = vpop.permute.xlu2 %770  ;;  %v811_v41 = vpop.permute.xlu1 %810 }
 0x20f   : > { %773 = vst.msk [vmem:[#allocation2 + $0x1c] sm:$0xc] %vm354_vm6, %v771_v40  ;;  %v807_v42 = vpop.permute.xlu0 %806 }
 0x210   : > { %813 = vst.msk [vmem:[#allocation2 + $0x3c] sm:$0xc] %vm354_vm6, %v811_v41 }
 0x211   : > { %823 = vst.msk [vmem:[#allocation2 + $0x3c] sm:$0xc] %vm392_vm8, %v799_v11 }
 0x212   : > { %809 = vst.msk [vmem:[#allocation2 + $0x3c] sm:$0x3] %vm349_vm4, %v807_v42 }
 0x215   : > { %v915_v56 = vpop.f32.mrf.mxu1 }
 0x216   : > { %v820_v43 = vpop.permute.xlu1 %819  ;;  %v767_v22 = vpop.permute.xlu2 %766 }
 0x217   : > { %822 = vst.msk [vmem:[#allocation2 + $0x3c] sm:$0x3] %vm386_vm7, %v820_v43  ;;  %v803_v44 = vpop.permute.xlu0 %802 }
 0x218   : > { %805 = vst.msk [vmem:[#allocation2 + $0x2c] sm:$0xc] %vm392_vm8, %v803_v44 }
 0x21d   : > { %v917_v60 = vpop.f32.mrf.mxu1 }
 0x21e   : > { %v709_v45 = vpop.permute.xlu1 %708  ;;  %v1174_v46 = vld [vmem:[#allocation2 + $0x38] sm:$0xf0] }
 0x21f   : > { %711 = vst.msk [vmem:[#allocation2 + $0xc] sm:$0xc] %vm334_vm5, %v709_v45  ;;  %v705_v48 = vpop.permute.xlu0 %704  ;;  %v1192_v47 = vld [vmem:[#allocation2 + $0x2c] sm:$0xf] }
 0x220   : > { %735 = vst.msk [vmem:[#allocation2 + $0xc] sm:$0xc] %vm354_vm6, %v1723_v51  ;;  %v1177_v49 = vor.u32 %v1192_v47, %v1174_v46 }
 0x221   : > { %707 = vst.msk [vmem:[#allocation2 + $0xc] sm:$0x3] %vm329_vm3, %v705_v48 }
 0x222   : > { %951 = vmatpush.bf16.msrb.mxu1 %v1177_v49 }
 0x226   : > { %v737_v50 = vpop.permute.xlu1 %736 }
 0x227   : > { %739 = vst.msk [vmem:[#allocation2 + $0x1c] sm:$0x3] %vm349_vm4, %v737_v50  ;;  %v732_v27 = vpop.permute.xlu0 %731 }
 0x228   : > { %769 = vst.msk [vmem:[#allocation2 + $0x1c] sm:$0x3] %vm386_vm7, %v767_v22 }
 0x229   : > { %734 = vst.msk [vmem:[#allocation2 + $0xc] sm:$0x3] %vm349_vm4, %v732_v27 }
 0x22e   : > { %v763_v52 = vpop.permute.xlu1 %762 }
 0x22f   : > { %765 = vst.msk [vmem:[#allocation2 + $0xc] sm:$0xc] %vm392_vm8, %v763_v52  ;;  %v758_v53 = vpop.permute.xlu0 %757 }
 0x230   : > { %760 = vst.msk [vmem:[#allocation2 + $0xc] sm:$0x3] %vm386_vm7, %v758_v53 }
 0x237   : > { %v795_v51 = vpop.permute.xlu0 %794  ;;  %v1188_v54 = vld [vmem:[#allocation2 + $0xc] sm:$0xf] }
 0x238   : > { %797 = vst.msk [vmem:[#allocation2 + $0x1c] sm:$0xc] %vm392_vm8, %v795_v51 }
 0x23f   : > { %v1158_v20 = vld [vmem:[#allocation2 + $0x18] sm:$0xf0] }
 0x240   : > { %v1161_v55 = vor.u32 %v1188_v54, %v1158_v20 }
 0x242   : > { %952 = vmatpush.bf16.msrb.mxu1 %v1161_v55 }
 0x245   : > { %1181 = vmatmul.msk.bf16.vlgmr.msrb.gmra.mxu1 %vm889_vm10, %v828_v39 }
 0x268   : > { %v928_v57 = vpop.f32.mrf.mxu2 }
 0x269   : > { %v958_v58 = vpack.c.bf16 %v928_v57, %v915_v56  ;;  %v962_v62 = vadd.f32 %v928_v57, %v915_v56 }
 0x26b   : > { %960 = vst [vmem:[%s232_s6] sm:$0xff] %v958_v58 }
 0x270   : > { %v930_v24 = vpop.f32.mrf.mxu2 }
 0x28b   : > { %v941_v59 = vpop.f32.mrf.mxu3 }
 0x28c   : > { %v963_v63 = vadd.f32 %v962_v62, %v941_v59 }
 0x293   : > { %v943_v61 = vpop.f32.mrf.mxu3 }
 0x2c2   : > { %v954_v0 = vpop.f32.mrf.mxu1 }
 0x2c3   : > { %v959_v1 = vpack.c.bf16 %v954_v0, %v941_v59  ;;  %v964_v16 = vadd.f32 %v963_v63, %v954_v0 }
 0x2c5   : > { %961 = vst [vmem:[%s232_s6 + $0x8] sm:$0xff] %v959_v1  ;;  %965 = vadd.xlane.f32.xlu1 %v964_v16 }
 0x2ca   : > { %v956_v2 = vpop.f32.mrf.mxu1 }
 0x338   : > { %v966_v3 = vpop.xlane.xlu1 %965 }
 0x339   : > { %v967_v26 = vmul.f32 0.001953125, %v966_v3  ;;  %982 = vst.msk [vmem:[%s241_s12] sm:$0xff] %vm981_vm11, %v966_v3 }
 0x33b   : > { %v968_v4 = vsub.f32 %v915_v56, %v967_v26  ;;  %v969_v5 = vsub.f32 %v928_v57, %v967_v26  ;;  %v970_v6 = vsub.f32 %v941_v59, %v967_v26  ;;  %v971_v7 = vsub.f32 %v954_v0, %v967_v26 }
 0x33d   : > { %v972_v8 = vmul.f32 %v968_v4, %v968_v4  ;;  %v973_v9 = vmul.f32 %v969_v5, %v969_v5  ;;  %v974_v10 = vmul.f32 %v970_v6, %v970_v6  ;;  %v975_v13 = vmul.f32 %v971_v7, %v971_v7 }
 0x33f   : > { %v976_v12 = vadd.f32 %v973_v9, %v972_v8 }
 0x341   : > { %v977_v14 = vadd.f32 %v976_v12, %v974_v10 }
 0x343   : > { %v978_v15 = vadd.f32 %v977_v14, %v975_v13 }
 0x345   : > { %979 = vadd.xlane.f32.xlu2 %v978_v15 }
 0x3b8   : > { %v980_v17 = vpop.xlane.xlu2 %979 }
 0x3b9   : > { %984 = vst.msk [vmem:[%s241_s12] sm:$0xff] %vm983_vm12, %v980_v17 }
 0x3ba PF: > { %s15_s19 = sadd.s32 1, %s1286_s19   ;;  %s1838_s15 = smov %s1278_s17 }
 0x3bb   : > { %p12_p8 = scmp.ge.s32.totalorder %s15_s19, 6   ;;  %s1839_s16 = smov %s1282_s18 }
 0x3bc   : > { %s1840_s17 = smov %s1843_s20  ;;  %s1841_s18 = smov %s1847_s21 }
 0x3bd   :  { %14 = sbr.rel (!%p12_p8) target bundleno = 3 (0x3), region = 75 }

</bundles_post_ra>
